<compile_context>
chip_gen: v7x
topology: tpu7x:2x2x1
jax: 0.10.0
libtpu: 0.0.40
codegen_flags: <defaults>
</compile_context>

<pallas_src>
import math

import jax
import jax.numpy as jnp
from jax.experimental import pallas as pl
from jax.experimental.pallas import tpu as pltpu

# ----------------------------- configuration -------------------------------
BATCH = 2
PLAYER_DIM = 12          # encoding.player_encoding().size()[0]
CARD_DIM = 24            # encoding.cards_encoding().size()[1]
NUM_CARDS = 7
WIDTH = 32               # d_model
NUM_LAYERS = 2
NHEAD = 4
SEQ = NUM_CARDS + 1      # player token + card tokens
LN_EPS = 1e-5            # torch.nn.LayerNorm default


def _layer_norm(x, w, b, eps=LN_EPS):
    """LayerNorm via sum(x)/sum(x*x): the two XLU reductions are independent."""
    n = x.shape[-1]
    s1 = jnp.sum(x, axis=-1, keepdims=True)
    s2 = jnp.sum(x * x, axis=-1, keepdims=True)
    mu = s1 * (1.0 / n)
    var = s2 * (1.0 / n) - mu * mu
    return (x - mu) * jax.lax.rsqrt(var + eps) * w + b


# --------------------------- weight slab packing ----------------------------
class _SlabPacker:
    """Packs parameter blocks into one (rows, 128) f32 slab (one DMA).

    Matrices are padded to a multiple of 8 rows; 1-row vectors are appended as
    individual rows at the end (no per-vector 8-row padding)."""

    def __init__(self):
        self._mat_blocks = []
        self._mat_rows = 0
        self._vec_rows = []
        self._vec_names = []
        self._offsets = {}

    def add_matrix(self, name, arr):
        arr = jnp.asarray(arr, jnp.float32)
        rows, cols = arr.shape
        assert cols <= 128, name
        rows8 = ((rows + 7) // 8) * 8
        buf = jnp.zeros((rows8, 128), jnp.float32).at[:rows, :cols].set(arr)
        self._offsets[name] = (self._mat_rows, rows, cols)
        self._mat_blocks.append(buf)
        self._mat_rows += rows8

    def add_vector(self, name, arr):
        arr = jnp.asarray(arr, jnp.float32).reshape(-1)
        cols = arr.shape[0]
        assert cols <= 128, name
        row = jnp.zeros((1, 128), jnp.float32).at[0, :cols].set(arr)
        self._vec_rows.append(row)
        self._vec_names.append((name, cols))

    def finish(self):
        base = self._mat_rows
        for i, (name, cols) in enumerate(self._vec_names):
            self._offsets[name] = (base + i, 1, cols)
        total = base + len(self._vec_rows)
        blocks = self._mat_blocks + self._vec_rows
        pad = (-total) % 8
        if pad:
            blocks.append(jnp.zeros((pad, 128), jnp.float32))
        return jnp.concatenate(blocks, axis=0), self._offsets


def pack_params(tp, *, nhead=NHEAD, width=WIDTH):
    """Torch-layout parameters -> (slab, offsets) consumed by the kernel."""
    D = width
    hd = D // nhead
    scale = 1.0 / math.sqrt(hd)
    player_dim = tp["fc_player_w"].shape[1]
    card_dim = tp["fc_cards_w"].shape[1]
    pk = _SlabPacker()

    # Fused embedding weight block.  Token input layout (see wrapper):
    #   cols [0:P)        player features (player token rows only)
    #   cols [P:P+C)      card features   (card token rows only)
    #   col  P+C          1.0 for player tokens (carries pad marker + fcp bias)
    #   col  P+C+1        1.0 for card tokens   (carries fcc bias)
    feat = player_dim + card_dim + 2
    feat_pad = ((feat + 7) // 8) * 8
    emb = jnp.zeros((feat_pad, D), jnp.float32)
    emb = emb.at[0:player_dim, 1:].set(jnp.asarray(tp["fc_player_w"], jnp.float32).T)
    emb = emb.at[player_dim:player_dim + card_dim, 1:].set(
        jnp.asarray(tp["fc_cards_w"], jnp.float32).T)
    emb = emb.at[player_dim + card_dim, 0].set(1.0)                 # pad marker
    emb = emb.at[player_dim + card_dim, 1:].set(
        jnp.asarray(tp["fc_player_b"], jnp.float32))
    emb = emb.at[player_dim + card_dim + 1, 1:].set(
        jnp.asarray(tp["fc_cards_b"], jnp.float32))
    pk.add_matrix("emb_w", emb)

    for l, lp in enumerate(tp["layers"]):
        # Standard torch lane order [q | k | v]; 1/sqrt(hd) folded into q cols.
        wT = jnp.asarray(lp["in_proj_w"], jnp.float32).T            # (D, 3D)
        bI = jnp.asarray(lp["in_proj_b"], jnp.float32)              # (3D,)
        wT = jnp.concatenate([wT[:, :D] * scale, wT[:, D:]], axis=1)
        bI = jnp.concatenate([bI[:D] * scale, bI[D:]])
        pk.add_matrix(f"inproj_w_{l}", wT)
        pk.add_vector(f"inproj_b_{l}", bI)
        pk.add_matrix(f"outproj_w_{l}", jnp.asarray(lp["out_proj_w"], jnp.float32).T)
        pk.add_vector(f"outproj_b_{l}", lp["out_proj_b"])
        pk.add_vector(f"ln1_w_{l}", lp["norm1_w"])
        pk.add_vector(f"ln1_b_{l}", lp["norm1_b"])
        pk.add_vector(f"ln2_w_{l}", lp["norm2_w"])
        pk.add_vector(f"ln2_b_{l}", lp["norm2_b"])
        pk.add_matrix(f"lin1_w_{l}", jnp.asarray(lp["lin1_w"], jnp.float32).T)
        pk.add_vector(f"lin1_b_{l}", lp["lin1_b"])
        pk.add_matrix(f"lin2_w_{l}", jnp.asarray(lp["lin2_w"], jnp.float32).T)
        pk.add_vector(f"lin2_b_{l}", lp["lin2_b"])

    pk.add_vector("lnf_w", tp["norm_w"])
    pk.add_vector("lnf_b", tp["norm_b"])
    return pk.finish()


# ------------------------------- the kernel --------------------------------
def make_kernel(offsets, *, batch, num_cards, num_layers, nhead, width):
    D = width
    hd = D // nhead
    S = num_cards + 1
    BS = batch * S
    # The xor trick for the block-diagonal mask needs S to be a power of two
    # (always true for this module: 7 cards + 1 player token = 8).
    assert S & (S - 1) == 0, "pass batch-id vectors as inputs for non-pow2 S"

    def kernel(x_in_ref, slab_ref, out_ref):
        f32 = jnp.float32

        def blk(name):
            off, rows, cols = offsets[name]
            return slab_ref[off:off + rows, :cols]

        # ---- fused token embedding: rows are already in token order --------
        x = jnp.dot(x_in_ref[...], blk("emb_w"),
                    preferred_element_type=f32)                     # (BS, D)

        # ---- block-diagonal additive mask, generated in-kernel -------------
        row = jax.lax.broadcasted_iota(jnp.int32, (BS, BS), 0)
        col = jax.lax.broadcasted_iota(jnp.int32, (BS, BS), 1)
        same = (row ^ col) < S          # same batch block <=> xor < S (pow2 S)
        mask2 = jnp.where(same, 0.0, -1e9)
        mask3 = jnp.broadcast_to(mask2[None], (nhead, BS, BS))      # hoisted

        for l in range(num_layers):
            # --- self-attention sub-block (pre-norm + raw residual, matching
            # TransformerEncoderPostNormLayer.forward()) ---
            h = _layer_norm(x, blk(f"ln1_w_{l}"), blk(f"ln1_b_{l}"))
            qkv = jnp.dot(h, blk(f"inproj_w_{l}"),
                          preferred_element_type=f32) + blk(f"inproj_b_{l}")
            # direct per-head slices (scale already folded into q weights)
            q3 = jnp.stack([qkv[:, 0 * D + hh * hd:0 * D + (hh + 1) * hd]
                            for hh in range(nhead)], axis=0)        # (H, BS, hd)
            k3 = jnp.stack([qkv[:, 1 * D + hh * hd:1 * D + (hh + 1) * hd]
                            for hh in range(nhead)], axis=0)
            v3 = jnp.stack([qkv[:, 2 * D + hh * hd:2 * D + (hh + 1) * hd]
                            for hh in range(nhead)], axis=0)

            logits = jnp.einsum("hqe,hke->hqk", q3, k3,
                                preferred_element_type=f32) + mask3
            m = jnp.max(logits, axis=-1, keepdims=True)
            p = jnp.exp(logits - m)
            denom = jnp.sum(p, axis=-1, keepdims=True)
            r = pl.reciprocal(denom, approx=True)       # EUP slot
            r = r * (2.0 - denom * r)                   # one Newton step
            p = p * r
            ctx = jnp.einsum("hqk,hke->hqe", p, v3,
                             preferred_element_type=f32)            # (H, BS, hd)

            # single out-proj matmul: concat heads on lanes -> (BS, D) x (D, D)
            ctx_cat = jnp.concatenate([ctx[hh] for hh in range(nhead)], axis=1)
            attn = jnp.dot(ctx_cat, blk(f"outproj_w_{l}"),
                           preferred_element_type=f32) + blk(f"outproj_b_{l}")
            x = x + attn

            # --- feed-forward sub-block (relu) ---
            h = _layer_norm(x, blk(f"ln2_w_{l}"), blk(f"ln2_b_{l}"))
            ff = jnp.dot(h, blk(f"lin1_w_{l}"),
                         preferred_element_type=f32) + blk(f"lin1_b_{l}")
            ff = jnp.maximum(ff, 0.0)
            ff = jnp.dot(ff, blk(f"lin2_w_{l}"),
                         preferred_element_type=f32) + blk(f"lin2_b_{l}")
            x = x + ff

        # final TransformerEncoder norm
        out_ref[...] = _layer_norm(x, blk("lnf_w"), blk("lnf_b"))

    return kernel


# --------------------------------- wrapper ----------------------------------
def transformer_with_context_forward(player, cards, packed, *,
                                     num_layers=NUM_LAYERS, nhead=NHEAD,
                                     width=WIDTH):
    slab, offsets = packed
    B, P = player.shape
    _, NC, C = cards.shape
    S = NC + 1
    D = width
    feat = P + C + 2
    feat_pad = ((feat + 7) // 8) * 8

    # Pre-interleave inputs into token order with one-hot token-type columns
    # (carries the fc biases and the 1.0/0.0 pad marker inside one matmul).
    x_in = jnp.zeros((B, S, feat_pad), jnp.float32)
    x_in = x_in.at[:, 0, :P].set(player)
    x_in = x_in.at[:, 1:, P:P + C].set(cards)
    x_in = x_in.at[:, 0, P + C].set(1.0)        # player-token type
    x_in = x_in.at[:, 1:, P + C + 1].set(1.0)   # card-token type
    x_in = x_in.reshape(B * S, feat_pad)

    kernel = make_kernel(offsets, batch=B, num_cards=NC,
                         num_layers=num_layers, nhead=nhead, width=D)

    vmem = pl.BlockSpec(memory_space=pltpu.MemorySpace.VMEM)
    full = pl.pallas_call(
        kernel,
        out_shape=jax.ShapeDtypeStruct((B * S, D), jnp.float32),
        in_specs=[vmem, vmem],
        out_specs=vmem,
    )(x_in, slab)

    full = full.reshape(B, S, D)
    return full[:, 0], full[:, 1:]


# ------------------------------ parameter init ------------------------------
def init_torch_params(key, *, player_dim=PLAYER_DIM, card_dim=CARD_DIM,
                      width=WIDTH, num_layers=NUM_LAYERS):
    """Parameters in PyTorch layout (Linear weight = (out, in)), with nonzero
    biases / LN affine params so the packed-weight path is fully exercised."""
    D = width

    def xavier(k, shape):
        fan_out, fan_in = shape
        bound = math.sqrt(6.0 / (fan_in + fan_out))
        return jax.random.uniform(k, shape, jnp.float32, -bound, bound)

    def unif(k, shape, bound):
        return jax.random.uniform(k, shape, jnp.float32, -bound, bound)

    ks = iter(jax.random.split(key, 64))
    tp = {
        "fc_player_w": xavier(next(ks), (D - 1, player_dim)),
        "fc_player_b": unif(next(ks), (D - 1,), 1.0 / math.sqrt(player_dim)),
        "fc_cards_w": xavier(next(ks), (D - 1, card_dim)),
        "fc_cards_b": unif(next(ks), (D - 1,), 1.0 / math.sqrt(card_dim)),
        "norm_w": 1.0 + 0.1 * unif(next(ks), (D,), 1.0),
        "norm_b": 0.1 * unif(next(ks), (D,), 1.0),
        "layers": [],
    }
    for _ in range(num_layers):
        lp = {
            "norm1_w": 1.0 + 0.1 * unif(next(ks), (D,), 1.0),
            "norm1_b": 0.1 * unif(next(ks), (D,), 1.0),
            "in_proj_w": xavier(next(ks), (3 * D, D)),
            "in_proj_b": 0.1 * unif(next(ks), (3 * D,), 1.0),
            "out_proj_w": xavier(next(ks), (D, D)),
            "out_proj_b": 0.1 * unif(next(ks), (D,), 1.0),
            "norm2_w": 1.0 + 0.1 * unif(next(ks), (D,), 1.0),
            "norm2_b": 0.1 * unif(next(ks), (D,), 1.0),
            "lin1_w": xavier(next(ks), (4 * D, D)),
            "lin1_b": unif(next(ks), (4 * D,), 1.0 / math.sqrt(D)),
            "lin2_w": xavier(next(ks), (D, 4 * D)),
            "lin2_b": unif(next(ks), (D,), 1.0 / math.sqrt(4 * D)),
        }
        tp["layers"].append(lp)
    return tp


# ---------------------------- pure-JAX reference ----------------------------
def reference_forward(player, cards, tp, *, num_layers=NUM_LAYERS,
                      nhead=NHEAD, width=WIDTH):
    """Direct transcription of the PyTorch module, consuming torch-layout
    params (independent check of the packing / folding)."""
    D = width
    hd = D // nhead
    B = player.shape[0]
    NC = cards.shape[1]

    def ln(x, w, b):
        mu = jnp.mean(x, axis=-1, keepdims=True)
        var = jnp.mean((x - mu) ** 2, axis=-1, keepdims=True)
        return (x - mu) * jax.lax.rsqrt(var + LN_EPS) * w + b

    pr = player @ tp["fc_player_w"].T + tp["fc_player_b"]           # (B, D-1)
    cr = cards @ tp["fc_cards_w"].T + tp["fc_cards_b"]              # (B, NC, D-1)
    pr = jnp.concatenate([jnp.ones((B, 1, 1), jnp.float32), pr[:, None, :]], axis=-1)
    cr = jnp.concatenate([jnp.zeros((B, NC, 1), jnp.float32), cr], axis=-1)
    x = jnp.concatenate([pr, cr], axis=1)                           # (B, S, D)
    S = x.shape[1]

    for lp in tp["layers"]:
        h = ln(x, lp["norm1_w"], lp["norm1_b"])
        qkv = h @ lp["in_proj_w"].T + lp["in_proj_b"]
        q, k, v = qkv[..., :D], qkv[..., D:2 * D], qkv[..., 2 * D:]
        qh = q.reshape(B, S, nhead, hd).transpose(0, 2, 1, 3)
        kh = k.reshape(B, S, nhead, hd).transpose(0, 2, 1, 3)
        vh = v.reshape(B, S, nhead, hd).transpose(0, 2, 1, 3)
        logits = (qh / math.sqrt(hd)) @ kh.transpose(0, 1, 3, 2)
        p = jax.nn.softmax(logits, axis=-1)
        attn = (p @ vh).transpose(0, 2, 1, 3).reshape(B, S, D)
        attn = attn @ lp["out_proj_w"].T + lp["out_proj_b"]
        x = x + attn
        h = ln(x, lp["norm2_w"], lp["norm2_b"])
        ff = jnp.maximum(h @ lp["lin1_w"].T + lp["lin1_b"], 0.0)
        ff = ff @ lp["lin2_w"].T + lp["lin2_b"]
        x = x + ff

    x = ln(x, tp["norm_w"], tp["norm_b"])
    return x[:, 0], x[:, 1:]


# ----------------------------------- main ------------------------------------
if __name__ == "__main__":
    key = jax.random.PRNGKey(0)
    k_player, k_cards, k_params = jax.random.split(key, 3)

    player = jax.random.normal(k_player, (BATCH, PLAYER_DIM), jnp.float32)
    cards = jax.random.normal(k_cards, (BATCH, NUM_CARDS, CARD_DIM), jnp.float32)

    torch_params = init_torch_params(k_params)
    packed = pack_params(torch_params)          # one (rows, 128) slab + offsets

    ctx_out, cards_out = transformer_with_context_forward(player, cards, packed)
    jax.block_until_ready((ctx_out, cards_out))

    ref_ctx, ref_cards = reference_forward(player, cards, torch_params)

    assert ctx_out.shape == (BATCH, WIDTH)
    assert cards_out.shape == (BATCH, NUM_CARDS, WIDTH)
    assert jnp.allclose(ctx_out, ref_ctx, atol=1e-3, rtol=1e-3), \
        float(jnp.max(jnp.abs(ctx_out - ref_ctx)))
    assert jnp.allclose(cards_out, ref_cards, atol=1e-3, rtol=1e-3), \
        float(jnp.max(jnp.abs(cards_out - ref_cards)))

    print("KERNEL_OK")
</pallas_src>

<mosaic_0001>
module attributes {stable_mosaic.version = 11 : i64} {
  func.func @kernel(%arg0: memref<16x40xf32, #tpu.memory_space<vmem>>, %arg1: memref<512x128xf32, #tpu.memory_space<vmem>>, %arg2: memref<16x32xf32, #tpu.memory_space<vmem>>) attributes {dimension_semantics = [], scalar_prefetch = 0 : i64, scratch_operands = 0 : i64, tpu.core_type = #tpu.core_type<tc>} {
    %c0 = arith.constant 0 : index
    %c0_0 = arith.constant 0 : index
    %0 = vector.load %arg0[%c0, %c0_0] : memref<16x40xf32, #tpu.memory_space<vmem>>, vector<16x40xf32>
    %c0_1 = arith.constant 0 : index
    %c0_2 = arith.constant 0 : index
    %1 = vector.load %arg1[%c0_1, %c0_2] : memref<512x128xf32, #tpu.memory_space<vmem>>, vector<40x32xf32>
    %cst = arith.constant dense<0.000000e+00> : vector<16x32xf32>
    %2 = tpu.matmul %0, %1, %cst {dimension_numbers = #tpu.dot_dimension_numbers<[1], [0], [0], [1], [0, 0, 1, 1], [], []>} : vector<16x40xf32>, vector<40x32xf32>, vector<16x32xf32> -> vector<16x32xf32>
    %3 = tpu.iota {dimensions = array<i32: 0>} : vector<16x16xi32>
    %4 = tpu.iota {dimensions = array<i32: 1>} : vector<16x16xi32>
    %5 = arith.xori %3, %4 : vector<16x16xi32>
    %c8_i32 = arith.constant 8 : i32
    %6 = vector.broadcast %c8_i32 : i32 to vector<16x16xi32>
    %7 = arith.cmpi slt, %5, %6 : vector<16x16xi32>
    %cst_3 = arith.constant 0.000000e+00 : f32
    %cst_4 = arith.constant -1.000000e+09 : f32
    %8 = vector.broadcast %cst_3 : f32 to vector<16x16xf32>
    %9 = vector.broadcast %cst_4 : f32 to vector<16x16xf32>
    %10 = arith.select %7, %8, %9 : vector<16x16xi1>, vector<16x16xf32>
    %11 = vector.shape_cast %10 : vector<16x16xf32> to vector<1x16x16xf32>
    %12 = vector.shape_cast %11 : vector<1x16x16xf32> to vector<1x16x16xf32>
    %13 = vector.broadcast %12 : vector<1x16x16xf32> to vector<4x16x16xf32>
    %c490 = arith.constant 490 : index
    %c0_5 = arith.constant 0 : index
    %14 = vector.load %arg1[%c490, %c0_5] : memref<512x128xf32, #tpu.memory_space<vmem>>, vector<1x32xf32>
    %c491 = arith.constant 491 : index
    %c0_6 = arith.constant 0 : index
    %15 = vector.load %arg1[%c491, %c0_6] : memref<512x128xf32, #tpu.memory_space<vmem>>, vector<1x32xf32>
    %cst_7 = arith.constant dense<0.000000e+00> : vector<16xf32>
    %16 = vector.multi_reduction <add>, %2, %cst_7 [1] : vector<16x32xf32> to vector<16xf32>
    %17 = vector.shape_cast %16 : vector<16xf32> to vector<16x1xf32>
    %18 = arith.mulf %2, %2 : vector<16x32xf32>
    %cst_8 = arith.constant dense<0.000000e+00> : vector<16xf32>
    %19 = vector.multi_reduction <add>, %18, %cst_8 [1] : vector<16x32xf32> to vector<16xf32>
    %20 = vector.shape_cast %19 : vector<16xf32> to vector<16x1xf32>
    %cst_9 = arith.constant 3.125000e-02 : f32
    %21 = vector.broadcast %cst_9 : f32 to vector<16x1xf32>
    %22 = arith.mulf %17, %21 : vector<16x1xf32>
    %cst_10 = arith.constant 3.125000e-02 : f32
    %23 = vector.broadcast %cst_10 : f32 to vector<16x1xf32>
    %24 = arith.mulf %20, %23 : vector<16x1xf32>
    %25 = arith.mulf %22, %22 : vector<16x1xf32>
    %26 = arith.subf %24, %25 : vector<16x1xf32>
    %27 = vector.broadcast %22 : vector<16x1xf32> to vector<16x32xf32>
    %28 = arith.subf %2, %27 : vector<16x32xf32>
    %cst_11 = arith.constant 9.99999974E-6 : f32
    %29 = vector.broadcast %cst_11 : f32 to vector<16x1xf32>
    %30 = arith.addf %26, %29 : vector<16x1xf32>
    %31 = math.rsqrt %30 : vector<16x1xf32>
    %32 = vector.broadcast %31 : vector<16x1xf32> to vector<16x32xf32>
    %33 = arith.mulf %28, %32 : vector<16x32xf32>
    %34 = vector.broadcast %14 : vector<1x32xf32> to vector<16x32xf32>
    %35 = arith.mulf %33, %34 : vector<16x32xf32>
    %36 = vector.broadcast %15 : vector<1x32xf32> to vector<16x32xf32>
    %37 = arith.addf %35, %36 : vector<16x32xf32>
    %c40 = arith.constant 40 : index
    %c0_12 = arith.constant 0 : index
    %38 = vector.load %arg1[%c40, %c0_12] : memref<512x128xf32, #tpu.memory_space<vmem>>, vector<32x96xf32>
    %cst_13 = arith.constant dense<0.000000e+00> : vector<16x96xf32>
    %39 = tpu.matmul %37, %38, %cst_13 {dimension_numbers = #tpu.dot_dimension_numbers<[1], [0], [0], [1], [0, 0, 1, 1], [], []>} : vector<16x32xf32>, vector<32x96xf32>, vector<16x96xf32> -> vector<16x96xf32>
    %c488 = arith.constant 488 : index
    %c0_14 = arith.constant 0 : index
    %40 = vector.load %arg1[%c488, %c0_14] : memref<512x128xf32, #tpu.memory_space<vmem>>, vector<1x96xf32>
    %41 = vector.broadcast %40 : vector<1x96xf32> to vector<16x96xf32>
    %42 = arith.addf %39, %41 : vector<16x96xf32>
    %43 = vector.extract_strided_slice %42 {offsets = [0, 0], sizes = [16, 8], strides = [1, 1]} : vector<16x96xf32> to vector<16x8xf32>
    %44 = vector.extract_strided_slice %42 {offsets = [0, 8], sizes = [16, 8], strides = [1, 1]} : vector<16x96xf32> to vector<16x8xf32>
    %45 = vector.extract_strided_slice %42 {offsets = [0, 16], sizes = [16, 8], strides = [1, 1]} : vector<16x96xf32> to vector<16x8xf32>
    %46 = vector.extract_strided_slice %42 {offsets = [0, 24], sizes = [16, 8], strides = [1, 1]} : vector<16x96xf32> to vector<16x8xf32>
    %47 = vector.shape_cast %43 : vector<16x8xf32> to vector<1x16x8xf32>
    %48 = vector.shape_cast %44 : vector<16x8xf32> to vector<1x16x8xf32>
    %49 = vector.shape_cast %45 : vector<16x8xf32> to vector<1x16x8xf32>
    %50 = vector.shape_cast %46 : vector<16x8xf32> to vector<1x16x8xf32>
    %51 = tpu.concatenate %47, %48, %49, %50 in 0 : vector<1x16x8xf32>, vector<1x16x8xf32>, vector<1x16x8xf32>, vector<1x16x8xf32> -> vector<4x16x8xf32>
    %52 = vector.extract_strided_slice %42 {offsets = [0, 32], sizes = [16, 8], strides = [1, 1]} : vector<16x96xf32> to vector<16x8xf32>
    %53 = vector.extract_strided_slice %42 {offsets = [0, 40], sizes = [16, 8], strides = [1, 1]} : vector<16x96xf32> to vector<16x8xf32>
    %54 = vector.extract_strided_slice %42 {offsets = [0, 48], sizes = [16, 8], strides = [1, 1]} : vector<16x96xf32> to vector<16x8xf32>
    %55 = vector.extract_strided_slice %42 {offsets = [0, 56], sizes = [16, 8], strides = [1, 1]} : vector<16x96xf32> to vector<16x8xf32>
    %56 = vector.shape_cast %52 : vector<16x8xf32> to vector<1x16x8xf32>
    %57 = vector.shape_cast %53 : vector<16x8xf32> to vector<1x16x8xf32>
    %58 = vector.shape_cast %54 : vector<16x8xf32> to vector<1x16x8xf32>
    %59 = vector.shape_cast %55 : vector<16x8xf32> to vector<1x16x8xf32>
    %60 = tpu.concatenate %56, %57, %58, %59 in 0 : vector<1x16x8xf32>, vector<1x16x8xf32>, vector<1x16x8xf32>, vector<1x16x8xf32> -> vector<4x16x8xf32>
    %61 = vector.extract_strided_slice %42 {offsets = [0, 64], sizes = [16, 8], strides = [1, 1]} : vector<16x96xf32> to vector<16x8xf32>
    %62 = vector.extract_strided_slice %42 {offsets = [0, 72], sizes = [16, 8], strides = [1, 1]} : vector<16x96xf32> to vector<16x8xf32>
    %63 = vector.extract_strided_slice %42 {offsets = [0, 80], sizes = [16, 8], strides = [1, 1]} : vector<16x96xf32> to vector<16x8xf32>
    %64 = vector.extract_strided_slice %42 {offsets = [0, 88], sizes = [16, 8], strides = [1, 1]} : vector<16x96xf32> to vector<16x8xf32>
    %65 = vector.shape_cast %61 : vector<16x8xf32> to vector<1x16x8xf32>
    %66 = vector.shape_cast %62 : vector<16x8xf32> to vector<1x16x8xf32>
    %67 = vector.shape_cast %63 : vector<16x8xf32> to vector<1x16x8xf32>
    %68 = vector.shape_cast %64 : vector<16x8xf32> to vector<1x16x8xf32>
    %69 = tpu.concatenate %65, %66, %67, %68 in 0 : vector<1x16x8xf32>, vector<1x16x8xf32>, vector<1x16x8xf32>, vector<1x16x8xf32> -> vector<4x16x8xf32>
    "tpu.trace_start"() <{level = 10 : i32, message = "hqe,hke->hqk"}> : () -> ()
    %cst_15 = arith.constant dense<0.000000e+00> : vector<4x16x16xf32>
    %70 = tpu.matmul %51, %60, %cst_15 {dimension_numbers = #tpu.dot_dimension_numbers<[2], [2], [1], [1], [0, 0, 0, 1, 1, 1], [0], [0]>} : vector<4x16x8xf32>, vector<4x16x8xf32>, vector<4x16x16xf32> -> vector<4x16x16xf32>
    "tpu.trace_stop"() : () -> ()
    %71 = arith.addf %70, %13 : vector<4x16x16xf32>
    %cst_16 = arith.constant dense<0xFF800000> : vector<4x16xf32>
    %72 = vector.multi_reduction <maximumf>, %71, %cst_16 [2] : vector<4x16x16xf32> to vector<4x16xf32>
    %73 = vector.shape_cast %72 : vector<4x16xf32> to vector<4x16x1xf32>
    %74 = vector.broadcast %73 : vector<4x16x1xf32> to vector<4x16x16xf32>
    %75 = arith.subf %71, %74 : vector<4x16x16xf32>
    %76 = math.exp %75 : vector<4x16x16xf32>
    %cst_17 = arith.constant dense<0.000000e+00> : vector<4x16xf32>
    %77 = vector.multi_reduction <add>, %76, %cst_17 [2] : vector<4x16x16xf32> to vector<4x16xf32>
    %78 = vector.shape_cast %77 : vector<4x16xf32> to vector<4x16x1xf32>
    %79 = tpu.reciprocal %78 {approx = true} : vector<4x16x1xf32> -> vector<4x16x1xf32>
    %80 = arith.mulf %78, %79 : vector<4x16x1xf32>
    %cst_18 = arith.constant 2.000000e+00 : f32
    %81 = vector.broadcast %cst_18 : f32 to vector<4x16x1xf32>
    %82 = arith.subf %81, %80 : vector<4x16x1xf32>
    %83 = arith.mulf %79, %82 : vector<4x16x1xf32>
    %84 = vector.broadcast %83 : vector<4x16x1xf32> to vector<4x16x16xf32>
    %85 = arith.mulf %76, %84 : vector<4x16x16xf32>
    "tpu.trace_start"() <{level = 10 : i32, message = "hqk,hke->hqe"}> : () -> ()
    %cst_19 = arith.constant dense<0.000000e+00> : vector<4x16x8xf32>
    %86 = tpu.matmul %85, %69, %cst_19 {dimension_numbers = #tpu.dot_dimension_numbers<[2], [1], [1], [2], [0, 0, 0, 1, 1, 2], [0], [0]>} : vector<4x16x16xf32>, vector<4x16x8xf32>, vector<4x16x8xf32> -> vector<4x16x8xf32>
    "tpu.trace_stop"() : () -> ()
    %87 = vector.extract_strided_slice %86 {offsets = [0, 0, 0], sizes = [1, 16, 8], strides = [1, 1, 1]} : vector<4x16x8xf32> to vector<1x16x8xf32>
    %88 = vector.shape_cast %87 : vector<1x16x8xf32> to vector<16x8xf32>
    %89 = vector.extract_strided_slice %86 {offsets = [1, 0, 0], sizes = [1, 16, 8], strides = [1, 1, 1]} : vector<4x16x8xf32> to vector<1x16x8xf32>
    %90 = vector.shape_cast %89 : vector<1x16x8xf32> to vector<16x8xf32>
    %91 = vector.extract_strided_slice %86 {offsets = [2, 0, 0], sizes = [1, 16, 8], strides = [1, 1, 1]} : vector<4x16x8xf32> to vector<1x16x8xf32>
    %92 = vector.shape_cast %91 : vector<1x16x8xf32> to vector<16x8xf32>
    %93 = vector.extract_strided_slice %86 {offsets = [3, 0, 0], sizes = [1, 16, 8], strides = [1, 1, 1]} : vector<4x16x8xf32> to vector<1x16x8xf32>
    %94 = vector.shape_cast %93 : vector<1x16x8xf32> to vector<16x8xf32>
    %95 = tpu.concatenate %88, %90, %92, %94 in 1 : vector<16x8xf32>, vector<16x8xf32>, vector<16x8xf32>, vector<16x8xf32> -> vector<16x32xf32>
    %c72 = arith.constant 72 : index
    %c0_20 = arith.constant 0 : index
    %96 = vector.load %arg1[%c72, %c0_20] : memref<512x128xf32, #tpu.memory_space<vmem>>, vector<32x32xf32>
    %cst_21 = arith.constant dense<0.000000e+00> : vector<16x32xf32>
    %97 = tpu.matmul %95, %96, %cst_21 {dimension_numbers = #tpu.dot_dimension_numbers<[1], [0], [0], [1], [0, 0, 1, 1], [], []>} : vector<16x32xf32>, vector<32x32xf32>, vector<16x32xf32> -> vector<16x32xf32>
    %c489 = arith.constant 489 : index
    %c0_22 = arith.constant 0 : index
    %98 = vector.load %arg1[%c489, %c0_22] : memref<512x128xf32, #tpu.memory_space<vmem>>, vector<1x32xf32>
    %99 = vector.broadcast %98 : vector<1x32xf32> to vector<16x32xf32>
    %100 = arith.addf %97, %99 : vector<16x32xf32>
    %101 = arith.addf %2, %100 : vector<16x32xf32>
    %c492 = arith.constant 492 : index
    %c0_23 = arith.constant 0 : index
    %102 = vector.load %arg1[%c492, %c0_23] : memref<512x128xf32, #tpu.memory_space<vmem>>, vector<1x32xf32>
    %c493 = arith.constant 493 : index
    %c0_24 = arith.constant 0 : index
    %103 = vector.load %arg1[%c493, %c0_24] : memref<512x128xf32, #tpu.memory_space<vmem>>, vector<1x32xf32>
    %cst_25 = arith.constant dense<0.000000e+00> : vector<16xf32>
    %104 = vector.multi_reduction <add>, %101, %cst_25 [1] : vector<16x32xf32> to vector<16xf32>
    %105 = vector.shape_cast %104 : vector<16xf32> to vector<16x1xf32>
    %106 = arith.mulf %101, %101 : vector<16x32xf32>
    %cst_26 = arith.constant dense<0.000000e+00> : vector<16xf32>
    %107 = vector.multi_reduction <add>, %106, %cst_26 [1] : vector<16x32xf32> to vector<16xf32>
    %108 = vector.shape_cast %107 : vector<16xf32> to vector<16x1xf32>
    %cst_27 = arith.constant 3.125000e-02 : f32
    %109 = vector.broadcast %cst_27 : f32 to vector<16x1xf32>
    %110 = arith.mulf %105, %109 : vector<16x1xf32>
    %cst_28 = arith.constant 3.125000e-02 : f32
    %111 = vector.broadcast %cst_28 : f32 to vector<16x1xf32>
    %112 = arith.mulf %108, %111 : vector<16x1xf32>
    %113 = arith.mulf %110, %110 : vector<16x1xf32>
    %114 = arith.subf %112, %113 : vector<16x1xf32>
    %115 = vector.broadcast %110 : vector<16x1xf32> to vector<16x32xf32>
    %116 = arith.subf %101, %115 : vector<16x32xf32>
    %cst_29 = arith.constant 9.99999974E-6 : f32
    %117 = vector.broadcast %cst_29 : f32 to vector<16x1xf32>
    %118 = arith.addf %114, %117 : vector<16x1xf32>
    %119 = math.rsqrt %118 : vector<16x1xf32>
    %120 = vector.broadcast %119 : vector<16x1xf32> to vector<16x32xf32>
    %121 = arith.mulf %116, %120 : vector<16x32xf32>
    %122 = vector.broadcast %102 : vector<1x32xf32> to vector<16x32xf32>
    %123 = arith.mulf %121, %122 : vector<16x32xf32>
    %124 = vector.broadcast %103 : vector<1x32xf32> to vector<16x32xf32>
    %125 = arith.addf %123, %124 : vector<16x32xf32>
    %c104 = arith.constant 104 : index
    %c0_30 = arith.constant 0 : index
    %126 = vector.load %arg1[%c104, %c0_30] : memref<512x128xf32, #tpu.memory_space<vmem>>, vector<32x128xf32>
    %cst_31 = arith.constant dense<0.000000e+00> : vector<16x128xf32>
    %127 = tpu.matmul %125, %126, %cst_31 {dimension_numbers = #tpu.dot_dimension_numbers<[1], [0], [0], [1], [0, 0, 1, 1], [], []>} : vector<16x32xf32>, vector<32x128xf32>, vector<16x128xf32> -> vector<16x128xf32>
    %c494 = arith.constant 494 : index
    %c0_32 = arith.constant 0 : index
    %128 = vector.load %arg1[%c494, %c0_32] : memref<512x128xf32, #tpu.memory_space<vmem>>, vector<1x128xf32>
    %129 = vector.broadcast %128 : vector<1x128xf32> to vector<16x128xf32>
    %130 = arith.addf %127, %129 : vector<16x128xf32>
    %cst_33 = arith.constant 0.000000e+00 : f32
    %131 = vector.broadcast %cst_33 : f32 to vector<16x128xf32>
    %132 = arith.maximumf %130, %131 : vector<16x128xf32>
    %c136 = arith.constant 136 : index
    %c0_34 = arith.constant 0 : index
    %133 = vector.load %arg1[%c136, %c0_34] : memref<512x128xf32, #tpu.memory_space<vmem>>, vector<128x32xf32>
    %cst_35 = arith.constant dense<0.000000e+00> : vector<16x32xf32>
    %134 = tpu.matmul %132, %133, %cst_35 {dimension_numbers = #tpu.dot_dimension_numbers<[1], [0], [0], [1], [0, 0, 1, 1], [], []>} : vector<16x128xf32>, vector<128x32xf32>, vector<16x32xf32> -> vector<16x32xf32>
    %c495 = arith.constant 495 : index
    %c0_36 = arith.constant 0 : index
    %135 = vector.load %arg1[%c495, %c0_36] : memref<512x128xf32, #tpu.memory_space<vmem>>, vector<1x32xf32>
    %136 = vector.broadcast %135 : vector<1x32xf32> to vector<16x32xf32>
    %137 = arith.addf %134, %136 : vector<16x32xf32>
    %138 = arith.addf %101, %137 : vector<16x32xf32>
    %c498 = arith.constant 498 : index
    %c0_37 = arith.constant 0 : index
    %139 = vector.load %arg1[%c498, %c0_37] : memref<512x128xf32, #tpu.memory_space<vmem>>, vector<1x32xf32>
    %c499 = arith.constant 499 : index
    %c0_38 = arith.constant 0 : index
    %140 = vector.load %arg1[%c499, %c0_38] : memref<512x128xf32, #tpu.memory_space<vmem>>, vector<1x32xf32>
    %cst_39 = arith.constant dense<0.000000e+00> : vector<16xf32>
    %141 = vector.multi_reduction <add>, %138, %cst_39 [1] : vector<16x32xf32> to vector<16xf32>
    %142 = vector.shape_cast %141 : vector<16xf32> to vector<16x1xf32>
    %143 = arith.mulf %138, %138 : vector<16x32xf32>
    %cst_40 = arith.constant dense<0.000000e+00> : vector<16xf32>
    %144 = vector.multi_reduction <add>, %143, %cst_40 [1] : vector<16x32xf32> to vector<16xf32>
    %145 = vector.shape_cast %144 : vector<16xf32> to vector<16x1xf32>
    %cst_41 = arith.constant 3.125000e-02 : f32
    %146 = vector.broadcast %cst_41 : f32 to vector<16x1xf32>
    %147 = arith.mulf %142, %146 : vector<16x1xf32>
    %cst_42 = arith.constant 3.125000e-02 : f32
    %148 = vector.broadcast %cst_42 : f32 to vector<16x1xf32>
    %149 = arith.mulf %145, %148 : vector<16x1xf32>
    %150 = arith.mulf %147, %147 : vector<16x1xf32>
    %151 = arith.subf %149, %150 : vector<16x1xf32>
    %152 = vector.broadcast %147 : vector<16x1xf32> to vector<16x32xf32>
    %153 = arith.subf %138, %152 : vector<16x32xf32>
    %cst_43 = arith.constant 9.99999974E-6 : f32
    %154 = vector.broadcast %cst_43 : f32 to vector<16x1xf32>
    %155 = arith.addf %151, %154 : vector<16x1xf32>
    %156 = math.rsqrt %155 : vector<16x1xf32>
    %157 = vector.broadcast %156 : vector<16x1xf32> to vector<16x32xf32>
    %158 = arith.mulf %153, %157 : vector<16x32xf32>
    %159 = vector.broadcast %139 : vector<1x32xf32> to vector<16x32xf32>
    %160 = arith.mulf %158, %159 : vector<16x32xf32>
    %161 = vector.broadcast %140 : vector<1x32xf32> to vector<16x32xf32>
    %162 = arith.addf %160, %161 : vector<16x32xf32>
    %c264 = arith.constant 264 : index
    %c0_44 = arith.constant 0 : index
    %163 = vector.load %arg1[%c264, %c0_44] : memref<512x128xf32, #tpu.memory_space<vmem>>, vector<32x96xf32>
    %cst_45 = arith.constant dense<0.000000e+00> : vector<16x96xf32>
    %164 = tpu.matmul %162, %163, %cst_45 {dimension_numbers = #tpu.dot_dimension_numbers<[1], [0], [0], [1], [0, 0, 1, 1], [], []>} : vector<16x32xf32>, vector<32x96xf32>, vector<16x96xf32> -> vector<16x96xf32>
    %c496 = arith.constant 496 : index
    %c0_46 = arith.constant 0 : index
    %165 = vector.load %arg1[%c496, %c0_46] : memref<512x128xf32, #tpu.memory_space<vmem>>, vector<1x96xf32>
    %166 = vector.broadcast %165 : vector<1x96xf32> to vector<16x96xf32>
    %167 = arith.addf %164, %166 : vector<16x96xf32>
    %168 = vector.extract_strided_slice %167 {offsets = [0, 0], sizes = [16, 8], strides = [1, 1]} : vector<16x96xf32> to vector<16x8xf32>
    %169 = vector.extract_strided_slice %167 {offsets = [0, 8], sizes = [16, 8], strides = [1, 1]} : vector<16x96xf32> to vector<16x8xf32>
    %170 = vector.extract_strided_slice %167 {offsets = [0, 16], sizes = [16, 8], strides = [1, 1]} : vector<16x96xf32> to vector<16x8xf32>
    %171 = vector.extract_strided_slice %167 {offsets = [0, 24], sizes = [16, 8], strides = [1, 1]} : vector<16x96xf32> to vector<16x8xf32>
    %172 = vector.shape_cast %168 : vector<16x8xf32> to vector<1x16x8xf32>
    %173 = vector.shape_cast %169 : vector<16x8xf32> to vector<1x16x8xf32>
    %174 = vector.shape_cast %170 : vector<16x8xf32> to vector<1x16x8xf32>
    %175 = vector.shape_cast %171 : vector<16x8xf32> to vector<1x16x8xf32>
    %176 = tpu.concatenate %172, %173, %174, %175 in 0 : vector<1x16x8xf32>, vector<1x16x8xf32>, vector<1x16x8xf32>, vector<1x16x8xf32> -> vector<4x16x8xf32>
    %177 = vector.extract_strided_slice %167 {offsets = [0, 32], sizes = [16, 8], strides = [1, 1]} : vector<16x96xf32> to vector<16x8xf32>
    %178 = vector.extract_strided_slice %167 {offsets = [0, 40], sizes = [16, 8], strides = [1, 1]} : vector<16x96xf32> to vector<16x8xf32>
    %179 = vector.extract_strided_slice %167 {offsets = [0, 48], sizes = [16, 8], strides = [1, 1]} : vector<16x96xf32> to vector<16x8xf32>
    %180 = vector.extract_strided_slice %167 {offsets = [0, 56], sizes = [16, 8], strides = [1, 1]} : vector<16x96xf32> to vector<16x8xf32>
    %181 = vector.shape_cast %177 : vector<16x8xf32> to vector<1x16x8xf32>
    %182 = vector.shape_cast %178 : vector<16x8xf32> to vector<1x16x8xf32>
    %183 = vector.shape_cast %179 : vector<16x8xf32> to vector<1x16x8xf32>
    %184 = vector.shape_cast %180 : vector<16x8xf32> to vector<1x16x8xf32>
    %185 = tpu.concatenate %181, %182, %183, %184 in 0 : vector<1x16x8xf32>, vector<1x16x8xf32>, vector<1x16x8xf32>, vector<1x16x8xf32> -> vector<4x16x8xf32>
    %186 = vector.extract_strided_slice %167 {offsets = [0, 64], sizes = [16, 8], strides = [1, 1]} : vector<16x96xf32> to vector<16x8xf32>
    %187 = vector.extract_strided_slice %167 {offsets = [0, 72], sizes = [16, 8], strides = [1, 1]} : vector<16x96xf32> to vector<16x8xf32>
    %188 = vector.extract_strided_slice %167 {offsets = [0, 80], sizes = [16, 8], strides = [1, 1]} : vector<16x96xf32> to vector<16x8xf32>
    %189 = vector.extract_strided_slice %167 {offsets = [0, 88], sizes = [16, 8], strides = [1, 1]} : vector<16x96xf32> to vector<16x8xf32>
    %190 = vector.shape_cast %186 : vector<16x8xf32> to vector<1x16x8xf32>
    %191 = vector.shape_cast %187 : vector<16x8xf32> to vector<1x16x8xf32>
    %192 = vector.shape_cast %188 : vector<16x8xf32> to vector<1x16x8xf32>
    %193 = vector.shape_cast %189 : vector<16x8xf32> to vector<1x16x8xf32>
    %194 = tpu.concatenate %190, %191, %192, %193 in 0 : vector<1x16x8xf32>, vector<1x16x8xf32>, vector<1x16x8xf32>, vector<1x16x8xf32> -> vector<4x16x8xf32>
    "tpu.trace_start"() <{level = 10 : i32, message = "hqe,hke->hqk"}> : () -> ()
    %cst_47 = arith.constant dense<0.000000e+00> : vector<4x16x16xf32>
    %195 = tpu.matmul %176, %185, %cst_47 {dimension_numbers = #tpu.dot_dimension_numbers<[2], [2], [1], [1], [0, 0, 0, 1, 1, 1], [0], [0]>} : vector<4x16x8xf32>, vector<4x16x8xf32>, vector<4x16x16xf32> -> vector<4x16x16xf32>
    "tpu.trace_stop"() : () -> ()
    %196 = arith.addf %195, %13 : vector<4x16x16xf32>
    %cst_48 = arith.constant dense<0xFF800000> : vector<4x16xf32>
    %197 = vector.multi_reduction <maximumf>, %196, %cst_48 [2] : vector<4x16x16xf32> to vector<4x16xf32>
    %198 = vector.shape_cast %197 : vector<4x16xf32> to vector<4x16x1xf32>
    %199 = vector.broadcast %198 : vector<4x16x1xf32> to vector<4x16x16xf32>
    %200 = arith.subf %196, %199 : vector<4x16x16xf32>
    %201 = math.exp %200 : vector<4x16x16xf32>
    %cst_49 = arith.constant dense<0.000000e+00> : vector<4x16xf32>
    %202 = vector.multi_reduction <add>, %201, %cst_49 [2] : vector<4x16x16xf32> to vector<4x16xf32>
    %203 = vector.shape_cast %202 : vector<4x16xf32> to vector<4x16x1xf32>
    %204 = tpu.reciprocal %203 {approx = true} : vector<4x16x1xf32> -> vector<4x16x1xf32>
    %205 = arith.mulf %203, %204 : vector<4x16x1xf32>
    %cst_50 = arith.constant 2.000000e+00 : f32
    %206 = vector.broadcast %cst_50 : f32 to vector<4x16x1xf32>
    %207 = arith.subf %206, %205 : vector<4x16x1xf32>
    %208 = arith.mulf %204, %207 : vector<4x16x1xf32>
    %209 = vector.broadcast %208 : vector<4x16x1xf32> to vector<4x16x16xf32>
    %210 = arith.mulf %201, %209 : vector<4x16x16xf32>
    "tpu.trace_start"() <{level = 10 : i32, message = "hqk,hke->hqe"}> : () -> ()
    %cst_51 = arith.constant dense<0.000000e+00> : vector<4x16x8xf32>
    %211 = tpu.matmul %210, %194, %cst_51 {dimension_numbers = #tpu.dot_dimension_numbers<[2], [1], [1], [2], [0, 0, 0, 1, 1, 2], [0], [0]>} : vector<4x16x16xf32>, vector<4x16x8xf32>, vector<4x16x8xf32> -> vector<4x16x8xf32>
    "tpu.trace_stop"() : () -> ()
    %212 = vector.extract_strided_slice %211 {offsets = [0, 0, 0], sizes = [1, 16, 8], strides = [1, 1, 1]} : vector<4x16x8xf32> to vector<1x16x8xf32>
    %213 = vector.shape_cast %212 : vector<1x16x8xf32> to vector<16x8xf32>
    %214 = vector.extract_strided_slice %211 {offsets = [1, 0, 0], sizes = [1, 16, 8], strides = [1, 1, 1]} : vector<4x16x8xf32> to vector<1x16x8xf32>
    %215 = vector.shape_cast %214 : vector<1x16x8xf32> to vector<16x8xf32>
    %216 = vector.extract_strided_slice %211 {offsets = [2, 0, 0], sizes = [1, 16, 8], strides = [1, 1, 1]} : vector<4x16x8xf32> to vector<1x16x8xf32>
    %217 = vector.shape_cast %216 : vector<1x16x8xf32> to vector<16x8xf32>
    %218 = vector.extract_strided_slice %211 {offsets = [3, 0, 0], sizes = [1, 16, 8], strides = [1, 1, 1]} : vector<4x16x8xf32> to vector<1x16x8xf32>
    %219 = vector.shape_cast %218 : vector<1x16x8xf32> to vector<16x8xf32>
    %220 = tpu.concatenate %213, %215, %217, %219 in 1 : vector<16x8xf32>, vector<16x8xf32>, vector<16x8xf32>, vector<16x8xf32> -> vector<16x32xf32>
    %c296 = arith.constant 296 : index
    %c0_52 = arith.constant 0 : index
    %221 = vector.load %arg1[%c296, %c0_52] : memref<512x128xf32, #tpu.memory_space<vmem>>, vector<32x32xf32>
    %cst_53 = arith.constant dense<0.000000e+00> : vector<16x32xf32>
    %222 = tpu.matmul %220, %221, %cst_53 {dimension_numbers = #tpu.dot_dimension_numbers<[1], [0], [0], [1], [0, 0, 1, 1], [], []>} : vector<16x32xf32>, vector<32x32xf32>, vector<16x32xf32> -> vector<16x32xf32>
    %c497 = arith.constant 497 : index
    %c0_54 = arith.constant 0 : index
    %223 = vector.load %arg1[%c497, %c0_54] : memref<512x128xf32, #tpu.memory_space<vmem>>, vector<1x32xf32>
    %224 = vector.broadcast %223 : vector<1x32xf32> to vector<16x32xf32>
    %225 = arith.addf %222, %224 : vector<16x32xf32>
    %226 = arith.addf %138, %225 : vector<16x32xf32>
    %c500 = arith.constant 500 : index
    %c0_55 = arith.constant 0 : index
    %227 = vector.load %arg1[%c500, %c0_55] : memref<512x128xf32, #tpu.memory_space<vmem>>, vector<1x32xf32>
    %c501 = arith.constant 501 : index
    %c0_56 = arith.constant 0 : index
    %228 = vector.load %arg1[%c501, %c0_56] : memref<512x128xf32, #tpu.memory_space<vmem>>, vector<1x32xf32>
    %cst_57 = arith.constant dense<0.000000e+00> : vector<16xf32>
    %229 = vector.multi_reduction <add>, %226, %cst_57 [1] : vector<16x32xf32> to vector<16xf32>
    %230 = vector.shape_cast %229 : vector<16xf32> to vector<16x1xf32>
    %231 = arith.mulf %226, %226 : vector<16x32xf32>
    %cst_58 = arith.constant dense<0.000000e+00> : vector<16xf32>
    %232 = vector.multi_reduction <add>, %231, %cst_58 [1] : vector<16x32xf32> to vector<16xf32>
    %233 = vector.shape_cast %232 : vector<16xf32> to vector<16x1xf32>
    %cst_59 = arith.constant 3.125000e-02 : f32
    %234 = vector.broadcast %cst_59 : f32 to vector<16x1xf32>
    %235 = arith.mulf %230, %234 : vector<16x1xf32>
    %cst_60 = arith.constant 3.125000e-02 : f32
    %236 = vector.broadcast %cst_60 : f32 to vector<16x1xf32>
    %237 = arith.mulf %233, %236 : vector<16x1xf32>
    %238 = arith.mulf %235, %235 : vector<16x1xf32>
    %239 = arith.subf %237, %238 : vector<16x1xf32>
    %240 = vector.broadcast %235 : vector<16x1xf32> to vector<16x32xf32>
    %241 = arith.subf %226, %240 : vector<16x32xf32>
    %cst_61 = arith.constant 9.99999974E-6 : f32
    %242 = vector.broadcast %cst_61 : f32 to vector<16x1xf32>
    %243 = arith.addf %239, %242 : vector<16x1xf32>
    %244 = math.rsqrt %243 : vector<16x1xf32>
    %245 = vector.broadcast %244 : vector<16x1xf32> to vector<16x32xf32>
    %246 = arith.mulf %241, %245 : vector<16x32xf32>
    %247 = vector.broadcast %227 : vector<1x32xf32> to vector<16x32xf32>
    %248 = arith.mulf %246, %247 : vector<16x32xf32>
    %249 = vector.broadcast %228 : vector<1x32xf32> to vector<16x32xf32>
    %250 = arith.addf %248, %249 : vector<16x32xf32>
    %c328 = arith.constant 328 : index
    %c0_62 = arith.constant 0 : index
    %251 = vector.load %arg1[%c328, %c0_62] : memref<512x128xf32, #tpu.memory_space<vmem>>, vector<32x128xf32>
    %cst_63 = arith.constant dense<0.000000e+00> : vector<16x128xf32>
    %252 = tpu.matmul %250, %251, %cst_63 {dimension_numbers = #tpu.dot_dimension_numbers<[1], [0], [0], [1], [0, 0, 1, 1], [], []>} : vector<16x32xf32>, vector<32x128xf32>, vector<16x128xf32> -> vector<16x128xf32>
    %c502 = arith.constant 502 : index
    %c0_64 = arith.constant 0 : index
    %253 = vector.load %arg1[%c502, %c0_64] : memref<512x128xf32, #tpu.memory_space<vmem>>, vector<1x128xf32>
    %254 = vector.broadcast %253 : vector<1x128xf32> to vector<16x128xf32>
    %255 = arith.addf %252, %254 : vector<16x128xf32>
    %cst_65 = arith.constant 0.000000e+00 : f32
    %256 = vector.broadcast %cst_65 : f32 to vector<16x128xf32>
    %257 = arith.maximumf %255, %256 : vector<16x128xf32>
    %c360 = arith.constant 360 : index
    %c0_66 = arith.constant 0 : index
    %258 = vector.load %arg1[%c360, %c0_66] : memref<512x128xf32, #tpu.memory_space<vmem>>, vector<128x32xf32>
    %cst_67 = arith.constant dense<0.000000e+00> : vector<16x32xf32>
    %259 = tpu.matmul %257, %258, %cst_67 {dimension_numbers = #tpu.dot_dimension_numbers<[1], [0], [0], [1], [0, 0, 1, 1], [], []>} : vector<16x128xf32>, vector<128x32xf32>, vector<16x32xf32> -> vector<16x32xf32>
    %c503 = arith.constant 503 : index
    %c0_68 = arith.constant 0 : index
    %260 = vector.load %arg1[%c503, %c0_68] : memref<512x128xf32, #tpu.memory_space<vmem>>, vector<1x32xf32>
    %261 = vector.broadcast %260 : vector<1x32xf32> to vector<16x32xf32>
    %262 = arith.addf %259, %261 : vector<16x32xf32>
    %263 = arith.addf %226, %262 : vector<16x32xf32>
    %c504 = arith.constant 504 : index
    %c0_69 = arith.constant 0 : index
    %264 = vector.load %arg1[%c504, %c0_69] : memref<512x128xf32, #tpu.memory_space<vmem>>, vector<1x32xf32>
    %c505 = arith.constant 505 : index
    %c0_70 = arith.constant 0 : index
    %265 = vector.load %arg1[%c505, %c0_70] : memref<512x128xf32, #tpu.memory_space<vmem>>, vector<1x32xf32>
    %cst_71 = arith.constant dense<0.000000e+00> : vector<16xf32>
    %266 = vector.multi_reduction <add>, %263, %cst_71 [1] : vector<16x32xf32> to vector<16xf32>
    %267 = vector.shape_cast %266 : vector<16xf32> to vector<16x1xf32>
    %268 = arith.mulf %263, %263 : vector<16x32xf32>
    %cst_72 = arith.constant dense<0.000000e+00> : vector<16xf32>
    %269 = vector.multi_reduction <add>, %268, %cst_72 [1] : vector<16x32xf32> to vector<16xf32>
    %270 = vector.shape_cast %269 : vector<16xf32> to vector<16x1xf32>
    %cst_73 = arith.constant 3.125000e-02 : f32
    %271 = vector.broadcast %cst_73 : f32 to vector<16x1xf32>
    %272 = arith.mulf %267, %271 : vector<16x1xf32>
    %cst_74 = arith.constant 3.125000e-02 : f32
    %273 = vector.broadcast %cst_74 : f32 to vector<16x1xf32>
    %274 = arith.mulf %270, %273 : vector<16x1xf32>
    %275 = arith.mulf %272, %272 : vector<16x1xf32>
    %276 = arith.subf %274, %275 : vector<16x1xf32>
    %277 = vector.broadcast %272 : vector<16x1xf32> to vector<16x32xf32>
    %278 = arith.subf %263, %277 : vector<16x32xf32>
    %cst_75 = arith.constant 9.99999974E-6 : f32
    %279 = vector.broadcast %cst_75 : f32 to vector<16x1xf32>
    %280 = arith.addf %276, %279 : vector<16x1xf32>
    %281 = math.rsqrt %280 : vector<16x1xf32>
    %282 = vector.broadcast %281 : vector<16x1xf32> to vector<16x32xf32>
    %283 = arith.mulf %278, %282 : vector<16x32xf32>
    %284 = vector.broadcast %264 : vector<1x32xf32> to vector<16x32xf32>
    %285 = arith.mulf %283, %284 : vector<16x32xf32>
    %286 = vector.broadcast %265 : vector<1x32xf32> to vector<16x32xf32>
    %287 = arith.addf %285, %286 : vector<16x32xf32>
    %c0_76 = arith.constant 0 : index
    %c0_77 = arith.constant 0 : index
    %288 = vector.load %arg2[%c0_76, %c0_77] : memref<16x32xf32, #tpu.memory_space<vmem>>, vector<16x32xf32>
    tpu.vector_store %arg2[%c0_76, %c0_77], %287 {strides = array<i32>} : memref<16x32xf32, #tpu.memory_space<vmem>>, vector<16x32xf32>,
    return
  }
}

</mosaic_0001>

<bundles_post_ra>
// kernel: tpu_custom_call.1
= control target key start
LH: loop header
LB: loop body
LE: loop exit
PB: predicated region body
PF: predicated region fallthrough
CT: control target
= control target key end

     0   :  { %7 = vsyncpa [#allocation3], 0  ;;  %s4192_s0 = inlined_call_operand.hbm [shape: f32[16,40], index: 0, kind: input, shape index: {}]   ;;  %s4193_s1 = inlined_call_operand.hbm [shape: f32[512,128], index: 1, kind: input, shape index: {}]   ;;  %s4194_s2 = inlined_call_operand.hbm [shape: f32[16,32], index: 2, kind: output, shape index: {}]  }
   0x1   :  { %8 = vsyncpa [#allocation6], 0 }
   0x2   :  { %9 = vsyncpa [#allocation4], 0  ;;  %s3765_s9 = smov [#allocation2]   ;;  %s3693_s13 = scalar_lea.hbm %s4192_s0, 256 }
   0x3   :  { %s15_s10 = sshll.u32 %s3765_s9, 4  ;;  %p3694_p0 = scmp.ne.s32.totalorder %s4192_s0, %s3693_s13  ;;  %s16_s10 = int_to_ptr.vmem [resolvable:$true] %s15_s10 }
   0x4   :  { %p3697_p1 = scmp.lt.u32.totalorder %s3693_s13, %s4192_s0 }
   0x6   :  { %p3699_p2 = pnand %p3697_p1, %p3694_p0 }
   0x8   :  { %3702 = shalt.err (!%p3699_p2)
}
   0x9   :  { %s3703_s18 = scalar_lea.vmem %s16_s10, 256  ;;  %p3708_p4 = scmp.lt.s32.totalorder %s16_s10, %s16_s10 }
   0xa   :  { %p3704_p3 = scmp.ne.s32.totalorder %s16_s10, %s3703_s18  ;;  %p3709_p5 = scmp.lt.s32.totalorder %s3703_s18, %s3703_s18 }
   0xc   :  { %p3710_p6 = por %p3709_p5, %p3708_p4 }
   0xe   :  { %p3711_p7 = pnand %p3710_p6, %p3704_p3 }
  0x10   :  { %3714 = shalt.err (!%p3711_p7)
}
  0x11   :  { %s3766_s19 = smov 128   ;;  %s3767_s20 = smov 8  }
  0x12   :  { %21 = dma.hbm_to_vmem [thread:$0]  %s4192_s0, 256, %s16_s10, [#allocation3], %s3766_s19, %s3766_s19, %s3767_s20  }
  0x13   :  { %s3768_s23 = smov [#allocation5]   ;;  %s3715_s27 = scalar_lea.hbm %s4193_s1, 8192 }
  0x14   :  { %s27_s24 = sshll.u32 %s3768_s23, 4  ;;  %p3716_p8 = scmp.ne.s32.totalorder %s4193_s1, %s3715_s27  ;;  %s28_s24 = int_to_ptr.vmem [resolvable:$true] %s27_s24 }
  0x15   :  { %p3719_p9 = scmp.lt.u32.totalorder %s3715_s27, %s4193_s1 }
  0x17   :  { %p3721_p10 = pnand %p3719_p9, %p3716_p8 }
  0x19   :  { %3724 = shalt.err (!%p3721_p10)
}
  0x1a   :  { %s3725_s4 = scalar_lea.vmem %s28_s24, 8192  ;;  %p3730_p12 = scmp.lt.s32.totalorder %s28_s24, %s28_s24 }
  0x1b   :  { %p3726_p11 = scmp.ne.s32.totalorder %s28_s24, %s3725_s4  ;;  %p3731_p13 = scmp.lt.s32.totalorder %s3725_s4, %s3725_s4 }
  0x1d   :  { %p3732_p0 = por %p3731_p13, %p3730_p12 }
  0x1f   :  { %p3733_p1 = pnand %p3732_p0, %p3726_p11 }
  0x21   :  { %3736 = shalt.err (!%p3733_p1)
}
  0x22   :  { %33 = dma.hbm_to_vmem [thread:$0]  %s4193_s1, 8192, %s28_s24, [#allocation6], %s3766_s19, %s3766_s19, %s3767_s20  }
  0x23   :  { %3759 = dma.done.wait [#allocation3], 256  }
  0x24   :  { %3760 = vsyncadd [#allocation3], 4294967040 }
  0x25   :  { %3761 = dma.done.wait [#allocation6], 8192  }
  0x26   :  { %3762 = vsyncadd [#allocation6], 4294959104  ;;  %vm47_vm0 = vcmask 326656   ;;  %v42_v0 = vld [vmem:[#allocation5] sm:$0xff]  ;;  %v43_v1 = vld [vmem:[#allocation5 + $0x8] sm:$0xff]  ;;  %vm142_vm1 = vcmask 261120  }
  0x27   :  { %v44_v2 = vld [vmem:[#allocation5 + $0x10] sm:$0xff]  ;;  %v3316_v3 = vpack.c.bf16 %v43_v1, %v42_v0  ;;  %v45_v4 = vld [vmem:[#allocation5 + $0x18] sm:$0xff]  ;;  %v46_v7 = vld [vmem:[#allocation5 + $0x20] sm:$0xff]  ;;  %vm293_vm2 = vcmask 64512   ;;  %s3769_s1 = smov 120   ;;  %s3770_s6 = smov 112  }
  0x28   :  { %v40_v5 = vld [vmem:[#allocation2] sm:$0xff]  ;;  %v3320_v6 = vpack.c.bf16 %v45_v4, %v44_v2  ;;  %v41_v8 = vld [vmem:[#allocation2 + $0x8] sm:$0xff]  ;;  %v185_v17 = vld [vmem:[#allocation5 + $0x28] sm:$0xff]  ;;  %s3771_s7 = smov 104   ;;  %s3772_s8 = smov 96   ;;  %vm638_vm6 = vcmask 130048  }
  0x29   :  { %3065 = vmatprep.mubr.msk.f32.mxu0 %vm47_vm0, %v40_v5  ;;  %3317 = vmatprep.subr.bf16.mxu0 %v3316_v3  ;;  %v186_v18 = vld [vmem:[#allocation5 + $0x30] sm:$0xff]  ;;  %v187_v19 = vld [vmem:[#allocation5 + $0x38] sm:$0xff]  ;;  %v188_v21 = vld [vmem:[#allocation5 + $0x40] sm:$0xff]  ;;  %s3774_s9 = smov 64   ;;  %s3775_s10 = smov 16   ;;  %vm1127_vm7 = vcmask 195584  }
  0x2a   :  { %3319 = vmatpush3.bf16.msra.mxu0 %v3316_v3  ;;  %v3324_v20 = vpack.c.bf16 %v186_v18, %v185_v17  ;;  %v3328_v22 = vpack.c.bf16 %v188_v21, %v187_v19  ;;  %v2834_v39 = vld [vmem:[#allocation5 + $0x1ea] ss:$0 sm:$0xff]  ;;  %v2835_v41 = vld [vmem:[#allocation5 + $0x1eb] ss:$0 sm:$0xff]  ;;  %v2836_v49 = vld [vmem:[#allocation5 + $0x1e8] ss:$0 sm:$0xff]  ;;  %v129_v19 = vlaneseq }
  0x2b   :  { %3321 = vmatprep.subr.bf16.mxu0 %v3320_v6  ;;  %vm3865_vm3 = vmpackc.low %vm293_vm2, %vm293_vm2  ;;  %s3776_s11 = smov 24   ;;  %s3777_s12 = smov [#allocation7]  }
  0x2c   :  { %s2819_s13 = sshll.u32 %s3777_s12, 4  ;;  %s2820_s13 = int_to_ptr.vmem [resolvable:$true] %s2819_s13 }
  0x2d   :  { %s3737_s14 = scalar_lea.vmem %s2820_s13, 256  ;;  %p3742_p3 = scmp.lt.s32.totalorder %s2820_s13, %s2820_s13 }
  0x2e   :  { %3323 = vmatpush3.bf16.msra.mxu0 %v3320_v6  ;;  %p3738_p2 = scmp.ne.s32.totalorder %s2820_s13, %s3737_s14  ;;  %p3743_p4 = scmp.lt.s32.totalorder %s3737_s14, %s3737_s14 }
  0x2f   :  { %3063 = vmatprep.subr.mxu0 %v46_v7 }
  0x30   :  { %p3744_p5 = por %p3743_p4, %p3742_p3 }
  0x32   :  { %3064 = vmatpush3.msra.mxu0 %v46_v7  ;;  %p3745_p6 = pnand %p3744_p5, %p3738_p2 }
  0x33   :  { %3066 = vmatmul.mubr.msk.f32.vlgmr.msra.gmra.mrb[0].mxu0 %vm47_vm0, %v41_v8  ;;  %3325 = vmatprep.subr.bf16.mxu0 %v3324_v20 }
  0x34   :  { %3327 = vmatpush3.bf16.msra.mxu0 %v3324_v20  ;;  %v130_v20 = vshrl.u32 %v129_v19, 7 }
  0x35   :  { %3329 = vmatprep.subr.bf16.mxu0 %v3328_v22 }
  0x36   :  { %v131_v21 = vadd.s32 8, %v130_v20 }
  0x38   :  { %3331 = vmatpush3.bf16.msra.mxu0 %v3328_v22  ;;  %v133_v22 = vand.u32 127, %v129_v19 }
 0x106   :  { %v3825_v9 = vpop.f32.mrb[0].mxu0 }
 0x107   :  { %v3827_v10 = vpop.f32.mrb[1].mxu0  ;;  %v150_v14 = vmul.f32 %v3825_v9, %v3825_v9  ;;  %v146_v15 = vsel %vm142_vm1, %v3825_v9, 0.0 }
 0x108   :  { %v143_v11 = vsel %vm142_vm1, %v3827_v10, 0.0  ;;  %v149_v12 = vmul.f32 %v3827_v10, %v3827_v10 }
 0x109   :  { %144 = vadd.xlane.f32.xlu0 %v143_v11  ;;  %v154_v16 = vsel %vm142_vm1, %v150_v14, 0.0 }
 0x10a   :  { %v151_v13 = vsel %vm142_vm1, %v149_v12, 0.0 }
 0x10b   :  { %152 = vadd.xlane.f32.xlu1 %v151_v13 }
 0x10d   :  { %147 = vadd.xlane.f32.xlu0 %v146_v15 }
 0x10f   :  { %155 = vadd.xlane.f32.xlu1 %v154_v16 }
 0x196   :  { %v145_v23 = vpop.xlane.xlu0 %144 }
 0x197   :  { %v157_v24 = vmul.f32 0.03125, %v145_v23  ;;  %v135_v23 = vxor.u32 %v133_v22, %v131_v21 }
 0x198   :  { %v153_v25 = vpop.xlane.xlu1 %152 }
 0x199   :  { %v161_v26 = vmul.f32 %v157_v24, %v157_v24  ;;  %v159_v27 = vmul.f32 0.03125, %v153_v25  ;;  %v165_v37 = vsub.f32 %v3827_v10, %v157_v24  ;;  %v134_v24 = vxor.u32 %v133_v22, %v130_v20 }
 0x19a   :  { %v148_v28 = vpop.xlane.xlu0 %147  ;;  %vm137_vm4 = vcmp.lt.s32.totalorder %v135_v23, 8  ;;  %v3773_v25 = vmov -1e+09  }
 0x19b   :  { %v163_v29 = vsub.f32 %v159_v27, %v161_v26  ;;  %v158_v30 = vmul.f32 0.03125, %v148_v28  ;;  %vm136_vm5 = vcmp.lt.s32.totalorder %v134_v24, 8  ;;  %v3895_v26 = vsel %vm137_vm4, 0.0, %v3773_v25 }
 0x19c   :  { %v156_v31 = vpop.xlane.xlu1 %155  ;;  %v3897_v27 = vsel %vm136_vm5, 0.0, %v3773_v25 }
 0x19d   :  { %v167_v32 = vadd.f32 1e-05, %v163_v29  ;;  %v162_v33 = vmul.f32 %v158_v30, %v158_v30  ;;  %v160_v34 = vmul.f32 0.03125, %v156_v31  ;;  %v166_v42 = vsub.f32 %v3825_v9, %v158_v30 }
 0x19f   :  { %3609 = vrsqrt.f32 %v167_v32  ;;  %v164_v35 = vsub.f32 %v160_v34, %v162_v33 }
 0x1a1   :  { %v168_v36 = vadd.f32 1e-05, %v164_v35 }
 0x1a3   :  { %3611 = vrsqrt.f32 %v168_v36 }
 0x1a9   :  { %v3610_v38 = vpop.eup %3609 }
 0x1aa   :  { %v171_v40 = vmul.f32 %v3610_v38, %v165_v37 }
 0x1ac   :  { %v177_v43 = vmul.f32 %v2834_v39, %v171_v40 }
 0x1ad   :  { %v3612_v44 = vpop.eup %3611 }
 0x1ae   :  { %v172_v45 = vmul.f32 %v3612_v44, %v166_v42  ;;  %v183_v46 = vadd.f32 %v2835_v41, %v177_v43 }
 0x1b0   :  { %v178_v47 = vmul.f32 %v2834_v39, %v172_v45  ;;  %3076 = vmatprep.mubr.msk.f32.mxu0 %vm142_vm1, %v183_v46 }
 0x1b2   :  { %v184_v48 = vadd.f32 %v2835_v41, %v178_v47 }
 0x1b4   :  { %3077 = vmatmul.mubr.msk.f32.vlgmr.msra.gmra.mrb[2].mxu0 %vm142_vm1, %v184_v48 }
 0x287   :  { %v3078_v50 = vpop.f32.mrb[2].mxu0 }
 0x288   :  { %v272_v51 = vadd.f32 %v3078_v50, %v2836_v49  ;;  %v266_v52 = vpop.f32.mrb[3].mxu0 }
 0x289   :  { %v267_v53 = vadd.f32 %v2836_v49, %v266_v52 }
 0x28a   :  { %279 = vrot.lane.b32.xlu1 %v272_v51, %s3769_s1 }
 0x28b   :  { %277 = vrot.lane.b32.xlu0 %v267_v53, %s3769_s1  ;;  %3083 = vmatprep.mubr.msk.f32.mxu0 %vm293_vm2, %v267_v53  ;;  %v3848_v54 = vpack.i.bf16 %v272_v51, %v267_v53 }
 0x28e   :  { %283 = vrot.lane.b32.xlu1 %v272_v51, %s3770_s6 }
 0x28f   :  { %285 = vrot.lane.b32.xlu0 %v267_v53, %s3771_s7 }
 0x292   :  { %281 = vrot.lane.b32.xlu1 %v267_v53, %s3770_s6 }
 0x293   :  { %3530 = vrot.lane.b32.xlu0 %v3848_v54, %s3772_s8 }
 0x296   :  { %287 = vrot.lane.b32.xlu1 %v272_v51, %s3771_s7 }
 0x2fc   :  { %v280_v55 = vpop.permute.xlu1 %279 }
 0x2fd   :  { %v278_v56 = vpop.permute.xlu0 %277 }
 0x2fe   :  { %v3854_v57 = vpack.i.bf16 %v280_v55, %v278_v56 }
 0x300   :  { %v284_v58 = vpop.permute.xlu1 %283  ;;  %3535 = vrot.lane.b32.xlu1 %v3854_v57, %s3772_s8 }
 0x301   :  { %v286_v59 = vpop.permute.xlu0 %285 }
 0x304   :  { %v282_v60 = vpop.permute.xlu1 %281 }
 0x305   :  { %v3858_v61 = vpack.i.bf16 %v284_v58, %v282_v60  ;;  %3097 = vmatprep.mubr.msk.f32.mxu1 %vm293_vm2, %v282_v60  ;;  %v3531_v62 = vpop.permute.xlu0 %3530 }
 0x306   :  { %v3533_v63 = vunpack.i.h.bf16 %v3531_v62  ;;  %v3532_v0 = vunpack.i.l.bf16 %v3531_v62 }
 0x307   :  { %3540 = vrot.lane.b32.xlu0 %v3858_v61, %s3772_s8 }
 0x308   :  { %v3332_v2 = vpack.c.bf16 %v3533_v63, %v3532_v0  ;;  %v288_v3 = vpop.permute.xlu1 %287 }
 0x309   :  { %v3869_v4 = vpack.i.bf16 %v288_v3, %v286_v59 }
 0x30a   :  { %3334 = vmatprep.subr.msk.bf16.mxu0 %vm3865_vm3, %v3332_v2 }
 0x30b   :  { %3545 = vrot.lane.b32.xlu1 %v3869_v4, %s3772_s8  ;;  %3337 = vmatpush3.bf16.xpose.msk.msra.mxu0 %vm3865_vm3, %v3332_v2 }
 0x312   :  { %3084 = vmatmul.mubr.msk.f32.vlgmr.msra.gmra.mrb[4].mxu0 %vm293_vm2, %v272_v51 }
 0x313   :  { %3090 = vmatprep.mubr.msk.f32.mxu0 %vm293_vm2, %v278_v56 }
 0x372   :  { %v3536_v5 = vpop.permute.xlu1 %3535 }
 0x373   :  { %v3538_v6 = vunpack.i.h.bf16 %v3536_v5  ;;  %v3537_v7 = vunpack.i.l.bf16 %v3536_v5 }
 0x375   :  { %v3338_v8 = vpack.c.bf16 %v3538_v6, %v3537_v7 }
 0x377   :  { %3340 = vmatprep.subr.msk.bf16.mxu0 %vm3865_vm3, %v3338_v8 }
 0x378   :  { %3343 = vmatpush3.bf16.xpose.msk.msra.mxu0 %vm3865_vm3, %v3338_v8 }
 0x379   :  { %v3541_v11 = vpop.permute.xlu0 %3540 }
 0x37a   :  { %v3543_v12 = vunpack.i.h.bf16 %v3541_v11  ;;  %v3542_v13 = vunpack.i.l.bf16 %v3541_v11 }
 0x37c   :  { %v3344_v14 = vpack.c.bf16 %v3543_v12, %v3542_v13 }
 0x37d   :  { %v3546_v15 = vpop.permute.xlu1 %3545 }
 0x37e   :  { %v3548_v16 = vunpack.i.h.bf16 %v3546_v15  ;;  %v3547_v17 = vunpack.i.l.bf16 %v3546_v15  ;;  %3346 = vmatprep.subr.msk.bf16.mxu1 %vm3865_vm3, %v3344_v14 }
 0x37f   :  { %3091 = vmatmul.mubr.msk.f32.vlgmr.msra.gmra.mrb[6].mxu0 %vm293_vm2, %v280_v55  ;;  %3349 = vmatpush3.bf16.xpose.msk.msra.mxu1 %vm3865_vm3, %v3344_v14 }
 0x380   :  { %v3350_v18 = vpack.c.bf16 %v3548_v16, %v3547_v17  ;;  %3104 = vmatprep.mubr.msk.f32.mxu0 %vm293_vm2, %v286_v59 }
 0x382   :  { %3352 = vmatprep.subr.msk.bf16.mxu0 %vm3865_vm3, %v3350_v18 }
 0x383   :  { %3355 = vmatpush3.bf16.xpose.msk.msra.mxu0 %vm3865_vm3, %v3350_v18 }
 0x386   :  { %3098 = vmatmul.mubr.msk.f32.vlgmr.msra.gmra.mrb[0].mxu1 %vm293_vm2, %v284_v58 }
 0x38a   :  { %3105 = vmatmul.mubr.msk.f32.vlgmr.msra.gmra.mrb[8].mxu0 %vm293_vm2, %v288_v3 }
 0x3e5   :  { %v3085_v28 = vpop.f32.mrb[4].mxu0 }
 0x3e6   :  { %v374_v29 = vadd.f32 %v3085_v28, %v3895_v26  ;;  %v368_v30 = vpop.f32.mrb[5].mxu0 }
 0x3e7   :  { %v369_v31 = vadd.f32 %v368_v30, %v3897_v27 }
 0x3e8   :  { %v642_v32 = vsel %vm638_vm6, %v374_v29, -inf }
 0x3e9   :  { %643 = vmax.xlane.f32.xlu1 %v642_v32  ;;  %v639_v33 = vsel %vm638_vm6, %v369_v31, -inf }
 0x3ea   :  { %640 = vmax.xlane.f32.xlu0 %v639_v33 }
 0x452   :  { %v3092_v34 = vpop.f32.mrb[6].mxu0 }
 0x453   :  { %v461_v35 = vadd.f32 %v3092_v34, %v3895_v26  ;;  %v455_v36 = vpop.f32.mrb[7].mxu0 }
 0x454   :  { %v456_v37 = vadd.f32 %v455_v36, %v3897_v27 }
 0x455   :  { %v648_v38 = vsel %vm638_vm6, %v461_v35, -inf }
 0x456   :  { %649 = vmax.xlane.f32.xlu0 %v648_v38  ;;  %v645_v40 = vsel %vm638_vm6, %v456_v37, -inf }
 0x459   :  { %v3099_v39 = vpop.f32.mrb[0].mxu1 }
 0x45a   :  { %v548_v41 = vadd.f32 %v3099_v39, %v3895_v26  ;;  %v542_v42 = vpop.f32.mrb[1].mxu1  ;;  %646 = vmax.xlane.f32.xlu0 %v645_v40 }
 0x45b   :  { %v543_v43 = vadd.f32 %v542_v42, %v3897_v27 }
 0x45c   :  { %v654_v44 = vsel %vm638_vm6, %v548_v41, -inf }
 0x45d   :  { %655 = vmax.xlane.f32.xlu1 %v654_v44  ;;  %v3106_v45 = vpop.f32.mrb[8].mxu0  ;;  %v651_v46 = vsel %vm638_vm6, %v543_v43, -inf }
 0x45e   :  { %v635_v47 = vadd.f32 %v3106_v45, %v3895_v26  ;;  %v629_v48 = vpop.f32.mrb[9].mxu0  ;;  %652 = vmax.xlane.f32.xlu0 %v651_v46 }
 0x45f   :  { %v630_v49 = vadd.f32 %v629_v48, %v3897_v27 }
 0x460   :  { %v660_v50 = vsel %vm638_vm6, %v635_v47, -inf }
 0x461   :  { %661 = vmax.xlane.f32.xlu1 %v660_v50  ;;  %v657_v51 = vsel %vm638_vm6, %v630_v49, -inf }
 0x462   :  { %658 = vmax.xlane.f32.xlu0 %v657_v51 }
 0x476   :  { %v644_v52 = vpop.xlane.xlu1 %643 }
 0x477   :  { %v664_v53 = vsub.f32 %v374_v29, %v644_v52  ;;  %v641_v55 = vpop.xlane.xlu0 %640 }
 0x478   :  { %v663_v56 = vsub.f32 %v369_v31, %v641_v55 }
 0x479   :  { %v673_v58 = vmul.f32 1.442695, %v664_v53 }
 0x47a   :  { %v671_v59 = vmul.f32 1.442695, %v663_v56 }
 0x47b   :  { %3613 = vpow2.f32 %v673_v58 }
 0x47c   :  { %3615 = vpow2.f32 %v671_v59 }
 0x485   :  { %v3915_v60 = vpop.eup %3613 }
 0x486   :  { %v3616_v62 = vpop.eup %3615  ;;  %v690_v63 = vsel %vm638_vm6, %v3915_v60, 0.0 }
 0x487   :  { %691 = vadd.xlane.f32.xlu1 %v690_v63  ;;  %v687_v0 = vsel %vm638_vm6, %v3616_v62, 0.0 }
 0x488   :  { %688 = vadd.xlane.f32.xlu0 %v687_v0 }
 0x4e3   :  { %v650_v2 = vpop.xlane.xlu0 %649 }
 0x4e4   :  { %v666_v3 = vsub.f32 %v461_v35, %v650_v2 }
 0x4e6   :  { %v677_v5 = vmul.f32 1.442695, %v666_v3 }
 0x4e7   :  { %v647_v6 = vpop.xlane.xlu0 %646 }
 0x4e8   :  { %3617 = vpow2.f32 %v677_v5  ;;  %v665_v7 = vsub.f32 %v456_v37, %v647_v6 }
 0x4ea   :  { %v675_v8 = vmul.f32 1.442695, %v665_v7  ;;  %v656_v11 = vpop.xlane.xlu1 %655 }
 0x4eb   :  { %v668_v12 = vsub.f32 %v548_v41, %v656_v11  ;;  %v653_v13 = vpop.xlane.xlu0 %652 }
 0x4ec   :  { %3619 = vpow2.f32 %v675_v8  ;;  %v667_v14 = vsub.f32 %v543_v43, %v653_v13 }
 0x4ed   :  { %v681_v15 = vmul.f32 1.442695, %v668_v12 }
 0x4ee   :  { %v679_v16 = vmul.f32 1.442695, %v667_v14  ;;  %v662_v17 = vpop.xlane.xlu1 %661 }
 0x4ef   :  { %3621 = vpow2.f32 %v681_v15  ;;  %v670_v18 = vsub.f32 %v635_v47, %v662_v17  ;;  %v659_v19 = vpop.xlane.xlu0 %658 }
 0x4f0   :  { %3623 = vpow2.f32 %v679_v16  ;;  %v669_v20 = vsub.f32 %v630_v49, %v659_v19 }
 0x4f1   :  { %v685_v21 = vmul.f32 1.442695, %v670_v18 }
 0x4f2   :  { %v3920_v22 = vpop.eup %3617  ;;  %v683_v23 = vmul.f32 1.442695, %v669_v20 }
 0x4f3   :  { %3625 = vpow2.f32 %v685_v21  ;;  %v696_v24 = vsel %vm638_vm6, %v3920_v22, 0.0 }
 0x4f4   :  { %3627 = vpow2.f32 %v683_v23  ;;  %697 = vadd.xlane.f32.xlu1 %v696_v24 }
 0x4f6   :  { %v3924_v25 = vpop.eup %3619 }
 0x4f7   :  { %v693_v28 = vsel %vm638_vm6, %v3924_v25, 0.0 }
 0x4f8   :  { %694 = vadd.xlane.f32.xlu0 %v693_v28 }
 0x4f9   :  { %v3928_v29 = vpop.eup %3621 }
 0x4fa   :  { %v3930_v30 = vpop.eup %3623  ;;  %v702_v31 = vsel %vm638_vm6, %v3928_v29, 0.0 }
 0x4fb   :  { %703 = vadd.xlane.f32.xlu1 %v702_v31  ;;  %v699_v32 = vsel %vm638_vm6, %v3930_v30, 0.0 }
 0x4fc   :  { %700 = vadd.xlane.f32.xlu0 %v699_v32 }
 0x4fd   :  { %v3936_v33 = vpop.eup %3625 }
 0x4fe   :  { %v3938_v34 = vpop.eup %3627  ;;  %v708_v35 = vsel %vm638_vm6, %v3936_v33, 0.0 }
 0x4ff   :  { %709 = vadd.xlane.f32.xlu1 %v708_v35  ;;  %v705_v36 = vsel %vm638_vm6, %v3938_v34, 0.0 }
 0x500   :  { %706 = vadd.xlane.f32.xlu0 %v705_v36 }
 0x510   :  { %3555 = vrot.lane.b32.xlu1 %v3854_v57, %s3774_s9 }
 0x514   :  { %3560 = vrot.lane.b32.xlu1 %v3858_v61, %s3774_s9  ;;  %v692_v43 = vpop.xlane.xlu1 %691 }
 0x515   :  { %v689_v37 = vpop.xlane.xlu0 %688 }
 0x516   :  { %3629 = vrcp.f32 %v689_v37  ;;  %3550 = vrot.lane.b32.xlu0 %v3848_v54, %s3774_s9 }
 0x517   :  { %3631 = vrcp.f32 %v692_v43 }
 0x518   :  { %3565 = vrot.lane.b32.xlu1 %v3869_v4, %s3774_s9 }
 0x520   :  { %v3630_v38 = vpop.eup %3629 }
 0x521   :  { %v719_v39 = vmul.f32 %v3630_v38, %v689_v37  ;;  %v3632_v45 = vpop.eup %3631 }
 0x522   :  { %v720_v4 = vmul.f32 %v3632_v45, %v692_v43 }
 0x523   :  { %v727_v40 = vsub.f32 2.0, %v719_v39 }
 0x524   :  { %v728_v51 = vsub.f32 2.0, %v720_v4 }
 0x525   :  { %v735_v41 = vmul.f32 %v3630_v38, %v727_v40 }
 0x526   :  { %v736_v6 = vmul.f32 %v3632_v45, %v728_v51 }
 0x527   :  { %v743_v42 = vmul.f32 %v3616_v62, %v735_v41 }
 0x528   :  { %v744_v24 = vmul.f32 %v3915_v60, %v736_v6  ;;  %v2863_v6 = vld [vmem:[#allocation5 + $0x1e9] ss:$0 sm:$0xff] }
 0x529   :  { %3111 = vmatprep.mubr.msk.f32.mxu1 %vm638_vm6, %v743_v42 }
 0x581   :  { %v698_v57 = vpop.xlane.xlu1 %697 }
 0x582   :  { %3633 = vrcp.f32 %v698_v57 }
 0x585   :  { %v695_v61 = vpop.xlane.xlu0 %694 }
 0x586   :  { %3635 = vrcp.f32 %v695_v61 }
 0x588   :  { %v704_v44 = vpop.xlane.xlu1 %703 }
 0x589   :  { %3637 = vrcp.f32 %v704_v44  ;;  %v701_v54 = vpop.xlane.xlu0 %700 }
 0x58a   :  { %3639 = vrcp.f32 %v701_v54 }
 0x58c   :  { %v3634_v46 = vpop.eup %3633  ;;  %v710_v47 = vpop.xlane.xlu1 %709 }
 0x58d   :  { %v722_v48 = vmul.f32 %v3634_v46, %v698_v57  ;;  %3641 = vrcp.f32 %v710_v47  ;;  %v707_v49 = vpop.xlane.xlu0 %706 }
 0x58e   :  { %3643 = vrcp.f32 %v707_v49 }
 0x58f   :  { %v730_v52 = vsub.f32 2.0, %v722_v48 }
 0x590   :  { %v3636_v50 = vpop.eup %3635  ;;  %v3556_v53 = vpop.permute.xlu1 %3555 }
 0x591   :  { %v721_v55 = vmul.f32 %v3636_v50, %v695_v61  ;;  %v3558_v56 = vunpack.i.h.bf16 %v3556_v53  ;;  %v3557_v58 = vunpack.i.l.bf16 %v3556_v53  ;;  %v3551_v59 = vpop.permute.xlu0 %3550  ;;  %v738_v7 = vmul.f32 %v3634_v46, %v730_v52 }
 0x592   :  { %v3553_v62 = vunpack.i.h.bf16 %v3551_v59  ;;  %v3552_v63 = vunpack.i.l.bf16 %v3551_v59 }
 0x593   :  { %v3638_v0 = vpop.eup %3637  ;;  %v729_v2 = vsub.f32 2.0, %v721_v55  ;;  %v3360_v3 = vpack.c.bf16 %v3558_v56, %v3557_v58  ;;  %v746_v28 = vmul.f32 %v3920_v22, %v738_v7 }
 0x594   :  { %v3640_v5 = vpop.eup %3639  ;;  %v724_v8 = vmul.f32 %v3638_v0, %v704_v44  ;;  %v3356_v11 = vpack.c.bf16 %v3553_v62, %v3552_v63  ;;  %v3561_v12 = vpop.permute.xlu1 %3560  ;;  %v1131_v44 = vld [vmem:[#allocation5 + $0x50] sm:$0xff] }
 0x595   :  { %v737_v13 = vmul.f32 %v3636_v50, %v729_v2  ;;  %v723_v14 = vmul.f32 %v3640_v5, %v701_v54  ;;  %v3563_v15 = vunpack.i.h.bf16 %v3561_v12  ;;  %v3562_v16 = vunpack.i.l.bf16 %v3561_v12  ;;  %3361 = vmatprep.subr.bf16.mxu0 %v3360_v3  ;;  %v1133_v54 = vld [vmem:[#allocation5 + $0x60] sm:$0xff] }
 0x596   :  { %v732_v17 = vsub.f32 2.0, %v724_v8  ;;  %3357 = vmatprep.subr.bf16.mxu1 %v3356_v11  ;;  %3363 = vmatpush3.bf16.msra.mxu0 %v3360_v3 }
 0x597   :  { %v3642_v18 = vpop.eup %3641  ;;  %v745_v19 = vmul.f32 %v3924_v25, %v737_v13  ;;  %v731_v20 = vsub.f32 2.0, %v723_v14  ;;  %v3364_v21 = vpack.c.bf16 %v3563_v15, %v3562_v16  ;;  %3359 = vmatpush3.bf16.msra.mxu1 %v3356_v11 }
 0x598   :  { %v3644_v23 = vpop.eup %3643  ;;  %v740_v31 = vmul.f32 %v3638_v0, %v732_v17  ;;  %v726_v32 = vmul.f32 %v3642_v18, %v710_v47  ;;  %v3566_v35 = vpop.permute.xlu1 %3565 }
 0x599   :  { %v739_v36 = vmul.f32 %v3640_v5, %v731_v20  ;;  %v725_v37 = vmul.f32 %v3644_v23, %v707_v49  ;;  %v3568_v38 = vunpack.i.h.bf16 %v3566_v35  ;;  %v3567_v39 = vunpack.i.l.bf16 %v3566_v35  ;;  %3118 = vmatprep.mubr.msk.f32.mxu0 %vm638_vm6, %v745_v19  ;;  %3365 = vmatprep.subr.bf16.mxu1 %v3364_v21  ;;  %v1266_v19 = vld [vmem:[#allocation5 + $0x68] sm:$0xff]  ;;  %v1267_v20 = vld [vmem:[#allocation5 + $0x70] sm:$0xff]  ;;  %v1360_v35 = vld [vmem:[#allocation5 + $0x98] sm:$0xff] }
 0x59a   :  { %v734_v40 = vsub.f32 2.0, %v726_v32  ;;  %3112 = vmatmul.mubr.msk.f32.vlgmr.msra.gmra.mrb[2].mxu1 %vm638_vm6, %v744_v24  ;;  %3119 = vmatmul.mubr.msk.f32.vlgmr.msra.gmra.mrb[10].mxu0 %vm638_vm6, %v746_v28  ;;  %v748_v22 = vmul.f32 %v3928_v29, %v740_v31  ;;  %v1132_v29 = vld [vmem:[#allocation5 + $0x58] sm:$0xff]  ;;  %v1269_v24 = vld [vmem:[#allocation5 + $0x80] sm:$0xff]  ;;  %v1358_v31 = vld [vmem:[#allocation5 + $0x88] sm:$0xff] }
 0x59b   :  { %v747_v25 = vmul.f32 %v3930_v30, %v739_v36  ;;  %v733_v60 = vsub.f32 2.0, %v725_v37  ;;  %v3368_v41 = vpack.c.bf16 %v3568_v38, %v3567_v39  ;;  %3367 = vmatpush3.bf16.msra.mxu1 %v3364_v21  ;;  %v1130_v30 = vld [vmem:[#allocation5 + $0x48] sm:$0xff]  ;;  %v3376_v46 = vpack.c.bf16 %v1133_v54, %v1132_v29  ;;  %v1268_v21 = vld [vmem:[#allocation5 + $0x78] sm:$0xff]  ;;  %v1359_v32 = vld [vmem:[#allocation5 + $0x90] sm:$0xff] }
 0x59c   :  { %v742_v42 = vmul.f32 %v3642_v18, %v734_v40  ;;  %v3372_v45 = vpack.c.bf16 %v1131_v44, %v1130_v30  ;;  %v3384_v28 = vpack.c.bf16 %v1269_v24, %v1268_v21  ;;  %v3388_v36 = vpack.c.bf16 %v1359_v32, %v1358_v31  ;;  %v1361_v37 = vld [vmem:[#allocation5 + $0xa0] sm:$0xff]  ;;  %v1362_v39 = vld [vmem:[#allocation5 + $0xa8] sm:$0xff]  ;;  %v1363_v40 = vld [vmem:[#allocation5 + $0xb0] sm:$0xff] }
 0x59d   :  { %v741_v43 = vmul.f32 %v3644_v23, %v733_v60  ;;  %3125 = vmatprep.mubr.msk.f32.mxu1 %vm638_vm6, %v747_v25  ;;  %3369 = vmatprep.subr.bf16.mxu0 %v3368_v41  ;;  %v3380_v23 = vpack.c.bf16 %v1267_v20, %v1266_v19  ;;  %v3392_v38 = vpack.c.bf16 %v1361_v37, %v1360_v35  ;;  %v1364_v60 = vld [vmem:[#allocation5 + $0xb8] sm:$0xff]  ;;  %v1369_v30 = vld [vmem:[#allocation5 + $0xe0] sm:$0xff]  ;;  %v1371_v29 = vld [vmem:[#allocation5 + $0xf0] sm:$0xff] }
 0x59e   :  { %3126 = vmatmul.mubr.msk.f32.vlgmr.msra.gmra.mrb[4].mxu1 %vm638_vm6, %v748_v22  ;;  %3371 = vmatpush3.bf16.msra.mxu0 %v3368_v41  ;;  %v750_v61 = vmul.f32 %v3936_v33, %v742_v42  ;;  %v3396_v25 = vpack.c.bf16 %v1363_v40, %v1362_v39  ;;  %v1365_v41 = vld [vmem:[#allocation5 + $0xc0] sm:$0xff]  ;;  %v1366_v42 = vld [vmem:[#allocation5 + $0xc8] sm:$0xff] }
 0x59f   :  { %v749_v57 = vmul.f32 %v3938_v34, %v741_v43  ;;  %3373 = vmatprep.subr.bf16.mxu1 %v3372_v45  ;;  %3381 = vmatprep.subr.bf16.mxu0 %v3380_v23  ;;  %v3400_v22 = vpack.c.bf16 %v1365_v41, %v1364_v60  ;;  %v1367_v43 = vld [vmem:[#allocation5 + $0xd0] sm:$0xff]  ;;  %v2871_v24 = vld [vmem:[#allocation5 + $0x1ef] ss:$0 sm:$0xff] }
 0x5a0   :  { %3375 = vmatpush3.bf16.msra.mxu1 %v3372_v45  ;;  %v1370_v45 = vld [vmem:[#allocation5 + $0xe8] sm:$0xff]  ;;  %v1501_v41 = vld [vmem:[#allocation5 + $0x110] sm:$0xff] }
 0x5a1   :  { %3132 = vmatprep.mubr.msk.f32.mxu0 %vm638_vm6, %v749_v57  ;;  %3377 = vmatprep.subr.bf16.mxu1 %v3376_v46  ;;  %v3404_v57 = vpack.c.bf16 %v1367_v43, %v1366_v42  ;;  %v3412_v54 = vpack.c.bf16 %v1371_v29, %v1370_v45  ;;  %v1500_v60 = vld [vmem:[#allocation5 + $0x108] sm:$0xff]  ;;  %v1503_v43 = vld [vmem:[#allocation5 + $0x120] sm:$0xff] }
 0x5a2   :  { %3133 = vmatmul.mubr.msk.f32.vlgmr.msra.gmra.mrb[12].mxu0 %vm638_vm6, %v750_v61  ;;  %v1368_v61 = vld [vmem:[#allocation5 + $0xd8] sm:$0xff]  ;;  %v3420_v42 = vpack.c.bf16 %v1501_v41, %v1500_v60 }
 0x5a3   :  { %3383 = vmatpush3.bf16.msra.mxu0 %v3380_v23  ;;  %v3408_v44 = vpack.c.bf16 %v1369_v30, %v1368_v61 }
 0x5a4   :  { %3379 = vmatpush3.bf16.msra.mxu1 %v3376_v46  ;;  %3385 = vmatprep.subr.bf16.mxu0 %v3384_v28 }
 0x5a5   :  { %3389 = vmatprep.subr.bf16.mxu1 %v3388_v36 }
 0x5a7   :  { %3387 = vmatpush3.bf16.msra.mxu0 %v3384_v28 }
 0x5a8   :  { %3421 = vmatprep.subr.bf16.mxu0 %v3420_v42 }
 0x66d   :  { %v3113_v4 = vpop.f32.mrb[2].mxu1  ;;  %v3120_v47 = vpop.f32.mrb[10].mxu0 }
 0x66e   :  { %1103 = vrot.lane.b32.xlu1 %v3120_v47, %s3767_s20  ;;  %v829_v34 = vpop.f32.mrb[3].mxu1  ;;  %v916_v33 = vpop.f32.mrb[11].mxu0 }
 0x66f   :  { %1101 = vrot.lane.b32.xlu0 %v916_v33, %s3767_s20 }
 0x671   :  { %v3127_v48 = vpop.f32.mrb[4].mxu1 }
 0x672   :  { %1111 = vrot.lane.b32.xlu1 %v3127_v48, %s3775_s10  ;;  %v1003_v49 = vpop.f32.mrb[5].mxu1 }
 0x673   :  { %1109 = vrot.lane.b32.xlu0 %v1003_v49, %s3775_s10 }
 0x675   :  { %v3134_v50 = vpop.f32.mrb[12].mxu0 }
 0x676   :  { %v1090_v51 = vpop.f32.mrb[13].mxu0  ;;  %1119 = vrot.lane.b32.xlu1 %v3134_v50, %s3776_s11 }
 0x677   :  { %1117 = vrot.lane.b32.xlu0 %v1090_v51, %s3776_s11 }
 0x6e0   :  { %v1104_v52 = vpop.permute.xlu1 %1103 }
 0x6e1   :  { %v1102_v53 = vpop.permute.xlu0 %1101  ;;  %v1124_v62 = vsel %vm293_vm2, %v3113_v4, %v1104_v52 }
 0x6e2   :  { %v1123_v58 = vsel %vm293_vm2, %v829_v34, %v1102_v53 }
 0x6e4   :  { %v1112_v55 = vpop.permute.xlu1 %1111 }
 0x6e5   :  { %v1110_v56 = vpop.permute.xlu0 %1109  ;;  %v1126_v2 = vsel %vm638_vm6, %v1124_v62, %v1112_v55 }
 0x6e6   :  { %v1125_v63 = vsel %vm638_vm6, %v1123_v58, %v1110_v56 }
 0x6e8   :  { %v1120_v59 = vpop.permute.xlu1 %1119 }
 0x6e9   :  { %v1118_v0 = vpop.permute.xlu0 %1117  ;;  %v1129_v5 = vsel %vm1127_vm7, %v1126_v2, %v1120_v59  ;;  %v2867_v2 = vld [vmem:[#allocation5 + $0x1ed] ss:$0 sm:$0xff] }
 0x6ea   :  { %v1128_v3 = vsel %vm1127_vm7, %v1125_v63, %v1118_v0  ;;  %v2866_v63 = vld [vmem:[#allocation5 + $0x1ec] ss:$0 sm:$0xff] }
 0x6eb   :  { %3143 = vmatprep.mubr.msk.f32.mxu1 %vm142_vm1, %v1128_v3 }
 0x6ec   :  { %3144 = vmatmul.mubr.msk.f32.vlgmr.msra.gmra.mrb[6].mxu1 %vm142_vm1, %v1129_v5 }
 0x6ed   :  { %3391 = vmatpush3.bf16.msra.mxu1 %v3388_v36 }
 0x6ee   :  { %3393 = vmatprep.subr.bf16.mxu1 %v3392_v38 }
 0x6f1   :  { %3395 = vmatpush3.bf16.msra.mxu1 %v3392_v38 }
 0x6f2   :  { %3397 = vmatprep.subr.bf16.mxu1 %v3396_v25 }
 0x6f5   :  { %3399 = vmatpush3.bf16.msra.mxu1 %v3396_v25 }
 0x6f6   :  { %3401 = vmatprep.subr.bf16.mxu1 %v3400_v22 }
 0x6f9   :  { %3403 = vmatpush3.bf16.msra.mxu1 %v3400_v22  ;;  %v1502_v22 = vld [vmem:[#allocation5 + $0x118] sm:$0xff] }
 0x6fa   :  { %3405 = vmatprep.subr.bf16.mxu1 %v3404_v57 }
 0x6fd   :  { %3407 = vmatpush3.bf16.msra.mxu1 %v3404_v57  ;;  %v3424_v57 = vpack.c.bf16 %v1503_v43, %v1502_v22 }
 0x6fe   :  { %3409 = vmatprep.subr.bf16.mxu1 %v3408_v44 }
 0x701   :  { %3411 = vmatpush3.bf16.msra.mxu1 %v3408_v44 }
 0x702   :  { %3413 = vmatprep.subr.bf16.mxu1 %v3412_v54 }
 0x705   :  { %3415 = vmatpush3.bf16.msra.mxu1 %v3412_v54 }
 0x7bf   :  { %v3145_v7 = vpop.f32.mrb[6].mxu1 }
 0x7c0   :  { %v1217_v8 = vadd.f32 %v3145_v7, %v2863_v6  ;;  %v1211_v11 = vpop.f32.mrb[7].mxu1 }
 0x7c1   :  { %v1212_v12 = vadd.f32 %v2863_v6, %v1211_v11 }
 0x7c2   :  { %v3982_v13 = vadd.f32 %v3825_v9, %v1217_v8 }
 0x7c3   :  { %v3985_v14 = vadd.f32 %v1212_v12, %v3827_v10 }
 0x7c4   :  { %v1227_v15 = vsel %vm142_vm1, %v3982_v13, 0.0  ;;  %v1231_v9 = vmul.f32 %v3982_v13, %v3982_v13 }
 0x7c5   :  { %1228 = vadd.xlane.f32.xlu1 %v1227_v15  ;;  %v1224_v16 = vsel %vm142_vm1, %v3985_v14, 0.0  ;;  %v1230_v17 = vmul.f32 %v3985_v14, %v3985_v14  ;;  %v1372_v15 = vld [vmem:[#allocation5 + $0xf8] sm:$0xff] }
 0x7c6   :  { %1225 = vadd.xlane.f32.xlu0 %v1224_v16  ;;  %v1235_v10 = vsel %vm142_vm1, %v1231_v9, 0.0  ;;  %v1373_v16 = vld [vmem:[#allocation5 + $0x100] sm:$0xff] }
 0x7c7   :  { %v1232_v18 = vsel %vm142_vm1, %v1230_v17, 0.0  ;;  %v3416_v17 = vpack.c.bf16 %v1373_v16, %v1372_v15 }
 0x7c9   :  { %3417 = vmatprep.subr.bf16.mxu1 %v3416_v17 }
 0x7ca   :  { %1233 = vadd.xlane.f32.xlu0 %v1232_v18  ;;  %3419 = vmatpush3.bf16.msra.mxu1 %v3416_v17  ;;  %v2868_v18 = vld [vmem:[#allocation5 + $0x1ee] ss:$0 sm:$0xff] }
 0x7ce   :  { %1236 = vadd.xlane.f32.xlu0 %v1235_v10 }
 0x852   :  { %v1229_v47 = vpop.xlane.xlu1 %1228 }
 0x853   :  { %v1226_v46 = vpop.xlane.xlu0 %1225  ;;  %v1239_v33 = vmul.f32 0.03125, %v1229_v47 }
 0x854   :  { %v1238_v4 = vmul.f32 0.03125, %v1226_v46 }
 0x855   :  { %v1243_v52 = vmul.f32 %v1239_v33, %v1239_v33  ;;  %v1247_v3 = vsub.f32 %v3982_v13, %v1239_v33 }
 0x856   :  { %v1242_v48 = vmul.f32 %v1238_v4, %v1238_v4  ;;  %v1246_v59 = vsub.f32 %v3985_v14, %v1238_v4 }
 0x857   :  { %v1234_v34 = vpop.xlane.xlu0 %1233 }
 0x858   :  { %v1240_v49 = vmul.f32 0.03125, %v1234_v34 }
 0x85a   :  { %v1244_v50 = vsub.f32 %v1240_v49, %v1242_v48 }
 0x85b   :  { %v1237_v51 = vpop.xlane.xlu0 %1236 }
 0x85c   :  { %v1248_v53 = vadd.f32 1e-05, %v1244_v50  ;;  %v1241_v55 = vmul.f32 0.03125, %v1237_v51 }
 0x85e   :  { %3645 = vrsqrt.f32 %v1248_v53  ;;  %v1245_v56 = vsub.f32 %v1241_v55, %v1243_v52  ;;  %v2872_v55 = vld [vmem:[#allocation5 + $0x1f2] ss:$0 sm:$0xff] }
 0x860   :  { %v1249_v58 = vadd.f32 1e-05, %v1245_v56 }
 0x862   :  { %3647 = vrsqrt.f32 %v1249_v58 }
 0x868   :  { %v3646_v62 = vpop.eup %3645 }
 0x869   :  { %v1252_v0 = vmul.f32 %v3646_v62, %v1246_v59  ;;  %v2873_v62 = vld [vmem:[#allocation5 + $0x1f3] ss:$0 sm:$0xff] }
 0x86b   :  { %v1258_v5 = vmul.f32 %v2866_v63, %v1252_v0 }
 0x86c   :  { %v3648_v6 = vpop.eup %3647 }
 0x86d   :  { %v1253_v7 = vmul.f32 %v3648_v6, %v1247_v3  ;;  %v1264_v8 = vadd.f32 %v2867_v2, %v1258_v5  ;;  %v2874_v5 = vld [vmem:[#allocation5 + $0x1f0] ss:$0 sm:$0xff] }
 0x86f   :  { %v1259_v11 = vmul.f32 %v2866_v63, %v1253_v7  ;;  %3154 = vmatprep.mubr.msk.f32.mxu0 %vm142_vm1, %v1264_v8 }
 0x871   :  { %v1265_v12 = vadd.f32 %v2867_v2, %v1259_v11 }
 0x873   :  { %3155 = vmatmul.mubr.msk.f32.vlgmr.msra.gmra.mrb[14].mxu0 %vm142_vm1, %v1265_v12 }
 0x874   :  { %3423 = vmatpush3.bf16.msra.mxu0 %v3420_v42 }
 0x875   :  { %3425 = vmatprep.subr.bf16.mxu0 %v3424_v57 }
 0x878   :  { %3427 = vmatpush3.bf16.msra.mxu0 %v3424_v57 }
 0x946   :  { %v3156_v9 = vpop.f32.mrb[14].mxu0 }
 0x947   :  { %v1353_v10 = vadd.f32 %v3156_v9, %v2868_v18  ;;  %v1347_v19 = vpop.f32.mrb[15].mxu0 }
 0x948   :  { %v1348_v20 = vadd.f32 %v2868_v18, %v1347_v19 }
 0x949   :  { %v1357_v23 = vmax.f32 %v1353_v10, 0.0 }
 0x94a   :  { %v1356_v21 = vmax.f32 %v1348_v20, 0.0 }
 0x94c   :  { %3189 = vmatprep.mubr.f32.mxu1 %v1356_v21 }
 0x94d   :  { %3190 = vmatmul.mubr.f32.vlgmr.msra.gmra.mrb[8].mxu1 %v1357_v23 }
 0xa20   :  { %v3191_v28 = vpop.f32.mrb[8].mxu1 }
 0xa21   :  { %v1451_v31 = vadd.f32 %v3191_v28, %v2871_v24  ;;  %v1445_v32 = vpop.f32.mrb[9].mxu1 }
 0xa22   :  { %v1446_v35 = vadd.f32 %v2871_v24, %v1445_v32 }
 0xa23   :  { %v4002_v36 = vadd.f32 %v1451_v31, %v3982_v13 }
 0xa24   :  { %v4005_v37 = vadd.f32 %v1446_v35, %v3985_v14 }
 0xa25   :  { %v1461_v38 = vsel %vm142_vm1, %v4002_v36, 0.0  ;;  %v1465_v39 = vmul.f32 %v4002_v36, %v4002_v36 }
 0xa26   :  { %1462 = vadd.xlane.f32.xlu1 %v1461_v38  ;;  %v1458_v40 = vsel %vm142_vm1, %v4005_v37, 0.0  ;;  %v1464_v25 = vmul.f32 %v4005_v37, %v4005_v37 }
 0xa27   :  { %1459 = vadd.xlane.f32.xlu0 %v1458_v40  ;;  %v1469_v13 = vsel %vm142_vm1, %v1465_v39, 0.0 }
 0xa28   :  { %v1466_v14 = vsel %vm142_vm1, %v1464_v25, 0.0 }
 0xa2a   :  { %1470 = vadd.xlane.f32.xlu1 %v1469_v13 }
 0xa2b   :  { %1467 = vadd.xlane.f32.xlu0 %v1466_v14 }
 0xab3   :  { %v1463_v61 = vpop.xlane.xlu1 %1462 }
 0xab4   :  { %v1473_v30 = vmul.f32 0.03125, %v1463_v61  ;;  %v1460_v44 = vpop.xlane.xlu0 %1459 }
 0xab5   :  { %v1472_v45 = vmul.f32 0.03125, %v1460_v44 }
 0xab6   :  { %v1477_v54 = vmul.f32 %v1473_v30, %v1473_v30  ;;  %v1481_v51 = vsub.f32 %v4002_v36, %v1473_v30 }
 0xab7   :  { %v1471_v29 = vpop.xlane.xlu1 %1470  ;;  %v1476_v47 = vmul.f32 %v1472_v45, %v1472_v45  ;;  %v1480_v53 = vsub.f32 %v4005_v37, %v1472_v45 }
 0xab8   :  { %v1475_v46 = vmul.f32 0.03125, %v1471_v29  ;;  %v1468_v4 = vpop.xlane.xlu0 %1467 }
 0xab9   :  { %v1474_v34 = vmul.f32 0.03125, %v1468_v4 }
 0xaba   :  { %v1479_v33 = vsub.f32 %v1475_v46, %v1477_v54 }
 0xabb   :  { %v1478_v48 = vsub.f32 %v1474_v34, %v1476_v47 }
 0xabc   :  { %v1483_v49 = vadd.f32 1e-05, %v1479_v33 }
 0xabd   :  { %v1482_v50 = vadd.f32 1e-05, %v1478_v48 }
 0xabe   :  { %3649 = vrsqrt.f32 %v1483_v49 }
 0xabf   :  { %3651 = vrsqrt.f32 %v1482_v50 }
 0xac8   :  { %v3650_v52 = vpop.eup %3649 }
 0xac9   :  { %v3652_v56 = vpop.eup %3651  ;;  %v1487_v58 = vmul.f32 %v3650_v52, %v1481_v51 }
 0xaca   :  { %v1486_v59 = vmul.f32 %v3652_v56, %v1480_v53 }
 0xacb   :  { %v1493_v63 = vmul.f32 %v2872_v55, %v1487_v58 }
 0xacc   :  { %v1492_v0 = vmul.f32 %v2872_v55, %v1486_v59 }
 0xacd   :  { %v1499_v3 = vadd.f32 %v2873_v62, %v1493_v63 }
 0xace   :  { %v1498_v2 = vadd.f32 %v2873_v62, %v1492_v0 }
 0xad0   :  { %3200 = vmatprep.mubr.msk.f32.mxu0 %vm142_vm1, %v1498_v2 }
 0xad1   :  { %3201 = vmatmul.mubr.msk.f32.vlgmr.msra.gmra.mrb[16].mxu0 %vm142_vm1, %v1499_v3 }
 0xba4   :  { %v3202_v6 = vpop.f32.mrb[16].mxu0 }
 0xba5   :  { %v1587_v7 = vadd.f32 %v3202_v6, %v2874_v5  ;;  %v1581_v8 = vpop.f32.mrb[17].mxu0 }
 0xba6   :  { %v1582_v11 = vadd.f32 %v2874_v5, %v1581_v8 }
 0xba7   :  { %1594 = vrot.lane.b32.xlu1 %v1587_v7, %s3769_s1 }
 0xba8   :  { %1592 = vrot.lane.b32.xlu0 %v1582_v11, %s3769_s1  ;;  %3207 = vmatprep.mubr.msk.f32.mxu0 %vm293_vm2, %v1582_v11  ;;  %v4026_v12 = vpack.i.bf16 %v1587_v7, %v1582_v11 }
 0xbab   :  { %1598 = vrot.lane.b32.xlu1 %v1587_v7, %s3770_s6 }
 0xbac   :  { %1600 = vrot.lane.b32.xlu0 %v1582_v11, %s3771_s7 }
 0xbaf   :  { %1596 = vrot.lane.b32.xlu1 %v1582_v11, %s3770_s6 }
 0xbb0   :  { %3570 = vrot.lane.b32.xlu0 %v4026_v12, %s3772_s8 }
 0xbb3   :  { %1602 = vrot.lane.b32.xlu1 %v1587_v7, %s3771_s7 }
 0xc19   :  { %v1595_v15 = vpop.permute.xlu1 %1594 }
 0xc1a   :  { %v1593_v16 = vpop.permute.xlu0 %1592 }
 0xc1b   :  { %v4032_v17 = vpack.i.bf16 %v1595_v15, %v1593_v16 }
 0xc1d   :  { %v1599_v18 = vpop.permute.xlu1 %1598  ;;  %3575 = vrot.lane.b32.xlu1 %v4032_v17, %s3772_s8 }
 0xc1e   :  { %v1601_v9 = vpop.permute.xlu0 %1600 }
 0xc1f   :  { %3228 = vmatprep.mubr.msk.f32.mxu1 %vm293_vm2, %v1601_v9 }
 0xc21   :  { %v1597_v10 = vpop.permute.xlu1 %1596 }
 0xc22   :  { %v4037_v19 = vpack.i.bf16 %v1599_v18, %v1597_v10  ;;  %v3571_v20 = vpop.permute.xlu0 %3570 }
 0xc23   :  { %v3573_v21 = vunpack.i.h.bf16 %v3571_v20  ;;  %v3572_v23 = vunpack.i.l.bf16 %v3571_v20 }
 0xc24   :  { %3580 = vrot.lane.b32.xlu0 %v4037_v19, %s3772_s8 }
 0xc25   :  { %v3428_v24 = vpack.c.bf16 %v3573_v21, %v3572_v23  ;;  %v1603_v28 = vpop.permute.xlu1 %1602 }
 0xc26   :  { %v4041_v31 = vpack.i.bf16 %v1603_v28, %v1601_v9 }
 0xc27   :  { %3430 = vmatprep.subr.msk.bf16.mxu0 %vm3865_vm3, %v3428_v24 }
 0xc28   :  { %3585 = vrot.lane.b32.xlu1 %v4041_v31, %s3772_s8  ;;  %3433 = vmatpush3.bf16.xpose.msk.msra.mxu0 %vm3865_vm3, %v3428_v24 }
 0xc2f   :  { %3208 = vmatmul.mubr.msk.f32.vlgmr.msra.gmra.mrb[18].mxu0 %vm293_vm2, %v1587_v7 }
 0xc30   :  { %3214 = vmatprep.mubr.msk.f32.mxu0 %vm293_vm2, %v1593_v16 }
 0xc8f   :  { %v3576_v32 = vpop.permute.xlu1 %3575 }
 0xc90   :  { %v3578_v35 = vunpack.i.h.bf16 %v3576_v32  ;;  %v3577_v38 = vunpack.i.l.bf16 %v3576_v32 }
 0xc92   :  { %v3434_v39 = vpack.c.bf16 %v3578_v35, %v3577_v38 }
 0xc94   :  { %3436 = vmatprep.subr.msk.bf16.mxu0 %vm3865_vm3, %v3434_v39 }
 0xc95   :  { %3439 = vmatpush3.bf16.xpose.msk.msra.mxu0 %vm3865_vm3, %v3434_v39 }
 0xc96   :  { %v3581_v40 = vpop.permute.xlu0 %3580 }
 0xc97   :  { %v3583_v25 = vunpack.i.h.bf16 %v3581_v40  ;;  %v3582_v13 = vunpack.i.l.bf16 %v3581_v40 }
 0xc99   :  { %v3440_v14 = vpack.c.bf16 %v3583_v25, %v3582_v13 }
 0xc9a   :  { %v3586_v60 = vpop.permute.xlu1 %3585 }
 0xc9b   :  { %v3588_v41 = vunpack.i.h.bf16 %v3586_v60  ;;  %v3587_v22 = vunpack.i.l.bf16 %v3586_v60  ;;  %3442 = vmatprep.subr.msk.bf16.mxu0 %vm3865_vm3, %v3440_v14 }
 0xc9c   :  { %3215 = vmatmul.mubr.msk.f32.vlgmr.msra.gmra.mrb[20].mxu0 %vm293_vm2, %v1595_v15 }
 0xc9d   :  { %v3446_v42 = vpack.c.bf16 %v3588_v41, %v3587_v22  ;;  %3445 = vmatpush3.bf16.xpose.msk.msra.mxu0 %vm3865_vm3, %v3440_v14  ;;  %3221 = vmatprep.mubr.msk.f32.mxu0 %vm293_vm2, %v1597_v10 }
 0xc9f   :  { %3448 = vmatprep.subr.msk.bf16.mxu1 %vm3865_vm3, %v3446_v42 }
 0xca0   :  { %3451 = vmatpush3.bf16.xpose.msk.msra.mxu1 %vm3865_vm3, %v3446_v42 }
 0xca4   :  { %3222 = vmatmul.mubr.msk.f32.vlgmr.msra.gmra.mrb[22].mxu0 %vm293_vm2, %v1599_v18 }
 0xca7   :  { %3229 = vmatmul.mubr.msk.f32.vlgmr.msra.gmra.mrb[10].mxu1 %vm293_vm2, %v1603_v28 }
 0xd02   :  { %v3209_v43 = vpop.f32.mrb[18].mxu0 }
 0xd03   :  { %v1688_v57 = vadd.f32 %v3209_v43, %v3895_v26  ;;  %v1682_v61 = vpop.f32.mrb[19].mxu0 }
 0xd04   :  { %v1683_v30 = vadd.f32 %v1682_v61, %v3897_v27 }
 0xd05   :  { %v1955_v44 = vsel %vm638_vm6, %v1688_v57, -inf }
 0xd06   :  { %1956 = vmax.xlane.f32.xlu1 %v1955_v44  ;;  %v1952_v45 = vsel %vm638_vm6, %v1683_v30, -inf }
 0xd07   :  { %1953 = vmax.xlane.f32.xlu0 %v1952_v45 }
 0xd6f   :  { %v3216_v29 = vpop.f32.mrb[20].mxu0 }
 0xd70   :  { %v1775_v1 = vadd.f32 %v3216_v29, %v3895_v26  ;;  %v1769_v54 = vpop.f32.mrb[21].mxu0 }
 0xd71   :  { %v1770_v46 = vadd.f32 %v1769_v54, %v3897_v27 }
 0xd72   :  { %v1961_v4 = vsel %vm638_vm6, %v1775_v1, -inf }
 0xd73   :  { %1962 = vmax.xlane.f32.xlu0 %v1961_v4  ;;  %v1958_v47 = vsel %vm638_vm6, %v1770_v46, -inf }
 0xd77   :  { %v3223_v34 = vpop.f32.mrb[22].mxu0  ;;  %1959 = vmax.xlane.f32.xlu0 %v1958_v47 }
 0xd78   :  { %v1862_v33 = vadd.f32 %v3223_v34, %v3895_v26  ;;  %v1856_v48 = vpop.f32.mrb[23].mxu0 }
 0xd79   :  { %v1857_v49 = vadd.f32 %v1856_v48, %v3897_v27 }
 0xd7a   :  { %v3230_v50 = vpop.f32.mrb[10].mxu1  ;;  %v1967_v51 = vsel %vm638_vm6, %v1862_v33, -inf }
 0xd7b   :  { %v1949_v52 = vadd.f32 %v3230_v50, %v3895_v26  ;;  %v1943_v53 = vpop.f32.mrb[11].mxu1  ;;  %1968 = vmax.xlane.f32.xlu1 %v1967_v51  ;;  %v1964_v55 = vsel %vm638_vm6, %v1857_v49, -inf }
 0xd7c   :  { %v1944_v56 = vadd.f32 %v1943_v53, %v3897_v27  ;;  %1965 = vmax.xlane.f32.xlu0 %v1964_v55 }
 0xd7d   :  { %v1973_v58 = vsel %vm638_vm6, %v1949_v52, -inf }
 0xd7e   :  { %v1970_v59 = vsel %vm638_vm6, %v1944_v56, -inf }
 0xd7f   :  { %1974 = vmax.xlane.f32.xlu1 %v1973_v58 }
 0xd80   :  { %1971 = vmax.xlane.f32.xlu0 %v1970_v59 }
 0xd93   :  { %v1957_v62 = vpop.xlane.xlu1 %1956 }
 0xd94   :  { %v1977_v63 = vsub.f32 %v1688_v57, %v1957_v62  ;;  %v1954_v0 = vpop.xlane.xlu0 %1953 }
 0xd95   :  { %v1976_v2 = vsub.f32 %v1683_v30, %v1954_v0 }
 0xd96   :  { %v1986_v3 = vmul.f32 1.442695, %v1977_v63 }
 0xd97   :  { %v1984_v5 = vmul.f32 1.442695, %v1976_v2 }
 0xd98   :  { %3653 = vpow2.f32 %v1986_v3 }
 0xd99   :  { %3655 = vpow2.f32 %v1984_v5 }
 0xda2   :  { %v4083_v26 = vpop.eup %3653 }
 0xda3   :  { %v3656_v6 = vpop.eup %3655  ;;  %v2003_v27 = vsel %vm638_vm6, %v4083_v26, 0.0 }
 0xda4   :  { %2004 = vadd.xlane.f32.xlu1 %v2003_v27  ;;  %v2000_v7 = vsel %vm638_vm6, %v3656_v6, 0.0 }
 0xda5   :  { %2001 = vadd.xlane.f32.xlu0 %v2000_v7 }
 0xe00   :  { %v1963_v8 = vpop.xlane.xlu0 %1962 }
 0xe01   :  { %v1979_v11 = vsub.f32 %v1775_v1, %v1963_v8 }
 0xe03   :  { %v1990_v15 = vmul.f32 1.442695, %v1979_v11 }
 0xe04   :  { %v1960_v16 = vpop.xlane.xlu0 %1959 }
 0xe05   :  { %3657 = vpow2.f32 %v1990_v15  ;;  %v1978_v18 = vsub.f32 %v1770_v46, %v1960_v16 }
 0xe07   :  { %v1988_v9 = vmul.f32 1.442695, %v1978_v18 }
 0xe08   :  { %v1969_v10 = vpop.xlane.xlu1 %1968 }
 0xe09   :  { %3659 = vpow2.f32 %v1988_v9  ;;  %v1966_v20 = vpop.xlane.xlu0 %1965  ;;  %v1981_v21 = vsub.f32 %v1862_v33, %v1969_v10 }
 0xe0a   :  { %v1980_v23 = vsub.f32 %v1857_v49, %v1966_v20 }
 0xe0b   :  { %v1994_v39 = vmul.f32 1.442695, %v1981_v21 }
 0xe0c   :  { %v1975_v24 = vpop.xlane.xlu1 %1974  ;;  %v1992_v25 = vmul.f32 1.442695, %v1980_v23 }
 0xe0d   :  { %v1983_v28 = vsub.f32 %v1949_v52, %v1975_v24  ;;  %v1972_v32 = vpop.xlane.xlu0 %1971 }
 0xe0e   :  { %v1982_v35 = vsub.f32 %v1944_v56, %v1972_v32 }
 0xe0f   :  { %v4088_v38 = vpop.eup %3657  ;;  %v1998_v40 = vmul.f32 1.442695, %v1983_v28 }
 0xe10   :  { %v1996_v13 = vmul.f32 1.442695, %v1982_v35  ;;  %v2009_v14 = vsel %vm638_vm6, %v4088_v38, 0.0 }
 0xe11   :  { %3661 = vpow2.f32 %v1998_v40  ;;  %2010 = vadd.xlane.f32.xlu1 %v2009_v14 }
 0xe12   :  { %3663 = vpow2.f32 %v1996_v13 }
 0xe13   :  { %v4092_v60 = vpop.eup %3659  ;;  %3665 = vpow2.f32 %v1994_v39 }
 0xe14   :  { %3667 = vpow2.f32 %v1992_v25  ;;  %v2006_v41 = vsel %vm638_vm6, %v4092_v60, 0.0 }
 0xe15   :  { %2007 = vadd.xlane.f32.xlu0 %v2006_v41 }
 0xe1b   :  { %v4096_v22 = vpop.eup %3661 }
 0xe1c   :  { %v4098_v42 = vpop.eup %3663  ;;  %v2021_v43 = vsel %vm638_vm6, %v4096_v22, 0.0 }
 0xe1d   :  { %v4102_v57 = vpop.eup %3665  ;;  %2022 = vadd.xlane.f32.xlu1 %v2021_v43  ;;  %v2018_v61 = vsel %vm638_vm6, %v4098_v42, 0.0 }
 0xe1e   :  { %v4106_v30 = vpop.eup %3667  ;;  %2019 = vadd.xlane.f32.xlu0 %v2018_v61  ;;  %v2015_v44 = vsel %vm638_vm6, %v4102_v57, 0.0 }
 0xe1f   :  { %v2012_v45 = vsel %vm638_vm6, %v4106_v30, 0.0 }
 0xe21   :  { %2016 = vadd.xlane.f32.xlu1 %v2015_v44 }
 0xe22   :  { %2013 = vadd.xlane.f32.xlu0 %v2012_v45 }
 0xe31   :  { %v2005_v34 = vpop.xlane.xlu1 %2004 }
 0xe32   :  { %3595 = vrot.lane.b32.xlu1 %v4032_v17, %s3774_s9  ;;  %v2002_v29 = vpop.xlane.xlu0 %2001 }
 0xe33   :  { %3669 = vrcp.f32 %v2002_v29 }
 0xe34   :  { %3671 = vrcp.f32 %v2005_v34 }
 0xe36   :  { %3600 = vrot.lane.b32.xlu1 %v4037_v19, %s3774_s9 }
 0xe38   :  { %3590 = vrot.lane.b32.xlu0 %v4026_v12, %s3774_s9 }
 0xe3a   :  { %3605 = vrot.lane.b32.xlu1 %v4041_v31, %s3774_s9 }
 0xe3d   :  { %v3670_v1 = vpop.eup %3669 }
 0xe3e   :  { %v2032_v54 = vmul.f32 %v3670_v1, %v2002_v29  ;;  %v3672_v19 = vpop.eup %3671 }
 0xe3f   :  { %v2033_v31 = vmul.f32 %v3672_v19, %v2005_v34 }
 0xe40   :  { %v2040_v46 = vsub.f32 2.0, %v2032_v54 }
 0xe41   :  { %v2041_v55 = vsub.f32 2.0, %v2033_v31 }
 0xe42   :  { %v2048_v4 = vmul.f32 %v3670_v1, %v2040_v46 }
 0xe44   :  { %v2056_v47 = vmul.f32 %v3656_v6, %v2048_v4  ;;  %v2049_v6 = vmul.f32 %v3672_v19, %v2041_v55 }
 0xe46   :  { %3235 = vmatprep.mubr.msk.f32.mxu0 %vm638_vm6, %v2056_v47  ;;  %v2057_v23 = vmul.f32 %v4083_v26, %v2049_v6  ;;  %v2901_v6 = vld [vmem:[#allocation5 + $0x1f1] ss:$0 sm:$0xff] }
 0xe9e   :  { %v2011_v17 = vpop.xlane.xlu1 %2010 }
 0xea2   :  { %v2008_v33 = vpop.xlane.xlu0 %2007 }
 0xea3   :  { %3673 = vrcp.f32 %v2008_v33 }
 0xea4   :  { %3675 = vrcp.f32 %v2011_v17 }
 0xeaa   :  { %v2023_v48 = vpop.xlane.xlu1 %2022 }
 0xeab   :  { %3677 = vrcp.f32 %v2023_v48  ;;  %v2020_v12 = vpop.xlane.xlu0 %2019 }
 0xeac   :  { %3679 = vrcp.f32 %v2020_v12 }
 0xead   :  { %v3674_v49 = vpop.eup %3673 }
 0xeae   :  { %v2034_v50 = vmul.f32 %v3674_v49, %v2008_v33  ;;  %v2017_v51 = vpop.xlane.xlu1 %2016  ;;  %v3676_v52 = vpop.eup %3675  ;;  %v2444_v33 = vld [vmem:[#allocation5 + $0x138] sm:$0xff] }
 0xeaf   :  { %3681 = vrcp.f32 %v2017_v51  ;;  %v2014_v53 = vpop.xlane.xlu0 %2013  ;;  %v2035_v56 = vmul.f32 %v3676_v52, %v2011_v17 }
 0xeb0   :  { %3683 = vrcp.f32 %v2014_v53  ;;  %v2042_v58 = vsub.f32 2.0, %v2034_v50 }
 0xeb1   :  { %v2043_v7 = vsub.f32 2.0, %v2035_v56 }
 0xeb2   :  { %v3596_v59 = vpop.permute.xlu1 %3595  ;;  %v2050_v8 = vmul.f32 %v3674_v49, %v2042_v58 }
 0xeb3   :  { %v3591_v62 = vpop.permute.xlu0 %3590  ;;  %v3598_v63 = vunpack.i.h.bf16 %v3596_v59  ;;  %v3597_v0 = vunpack.i.l.bf16 %v3596_v59  ;;  %v2051_v35 = vmul.f32 %v3676_v52, %v2043_v7 }
 0xeb4   :  { %v3593_v2 = vunpack.i.h.bf16 %v3591_v62  ;;  %v3592_v3 = vunpack.i.l.bf16 %v3591_v62  ;;  %v2058_v39 = vmul.f32 %v4092_v60, %v2050_v8 }
 0xeb5   :  { %v3678_v5 = vpop.eup %3677  ;;  %v3456_v20 = vpack.c.bf16 %v3598_v63, %v3597_v0  ;;  %v2059_v60 = vmul.f32 %v4088_v38, %v2051_v35  ;;  %v2442_v38 = vld [vmem:[#allocation5 + $0x128] sm:$0xff] }
 0xeb6   :  { %v3680_v27 = vpop.eup %3679  ;;  %v2039_v11 = vmul.f32 %v3678_v5, %v2023_v48  ;;  %v3452_v15 = vpack.c.bf16 %v3593_v2, %v3592_v3  ;;  %v3601_v16 = vpop.permute.xlu1 %3600 }
 0xeb7   :  { %v2038_v18 = vmul.f32 %v3680_v27, %v2020_v12  ;;  %v3603_v9 = vunpack.i.h.bf16 %v3601_v16  ;;  %v3602_v10 = vunpack.i.l.bf16 %v3601_v16 }
 0xeb8   :  { %3453 = vmatprep.subr.bf16.mxu0 %v3452_v15  ;;  %v2047_v40 = vsub.f32 2.0, %v2039_v11 }
 0xeb9   :  { %v3682_v21 = vpop.eup %3681  ;;  %v2046_v24 = vsub.f32 2.0, %v2038_v18  ;;  %v3460_v28 = vpack.c.bf16 %v3603_v9, %v3602_v10  ;;  %3455 = vmatpush3.bf16.msra.mxu0 %v3452_v15 }
 0xeba   :  { %v3684_v32 = vpop.eup %3683  ;;  %v2037_v25 = vmul.f32 %v3682_v21, %v2017_v51  ;;  %v3606_v13 = vpop.permute.xlu1 %3605  ;;  %3457 = vmatprep.subr.bf16.mxu0 %v3456_v20  ;;  %v2055_v29 = vmul.f32 %v3678_v5, %v2047_v40  ;;  %v2671_v40 = vld [vmem:[#allocation5 + $0x170] sm:$0xff] }
 0xebb   :  { %v2054_v14 = vmul.f32 %v3680_v27, %v2046_v24  ;;  %v2036_v41 = vmul.f32 %v3684_v32, %v2014_v53  ;;  %v3608_v43 = vunpack.i.h.bf16 %v3606_v13  ;;  %v3607_v61 = vunpack.i.l.bf16 %v3606_v13  ;;  %3461 = vmatprep.subr.bf16.mxu1 %v3460_v28  ;;  %v2580_v24 = vld [vmem:[#allocation5 + $0x158] sm:$0xff] }
 0xebc   :  { %v2045_v44 = vsub.f32 2.0, %v2037_v25  ;;  %3236 = vmatmul.mubr.msk.f32.vlgmr.msra.gmra.mrb[24].mxu0 %vm638_vm6, %v2057_v23  ;;  %3463 = vmatpush3.bf16.msra.mxu1 %v3460_v28  ;;  %v2063_v47 = vmul.f32 %v4096_v22, %v2055_v29  ;;  %v2579_v23 = vld [vmem:[#allocation5 + $0x150] sm:$0xff]  ;;  %v2672_v25 = vld [vmem:[#allocation5 + $0x178] sm:$0xff]  ;;  %v2678_v29 = vld [vmem:[#allocation5 + $0x1a8] sm:$0xff] }
 0xebd   :  { %v2044_v26 = vsub.f32 2.0, %v2036_v41  ;;  %v3464_v45 = vpack.c.bf16 %v3608_v43, %v3607_v61  ;;  %3459 = vmatpush3.bf16.msra.mxu0 %v3456_v20  ;;  %3242 = vmatprep.mubr.msk.f32.mxu0 %vm638_vm6, %v2058_v39  ;;  %v2062_v54 = vmul.f32 %v4098_v42, %v2054_v14  ;;  %v2443_v42 = vld [vmem:[#allocation5 + $0x130] sm:$0xff]  ;;  %v2670_v39 = vld [vmem:[#allocation5 + $0x168] sm:$0xff]  ;;  %v2673_v14 = vld [vmem:[#allocation5 + $0x180] sm:$0xff] }
 0xebe   :  { %v2053_v1 = vmul.f32 %v3682_v21, %v2045_v44  ;;  %v3468_v17 = vpack.c.bf16 %v2443_v42, %v2442_v38  ;;  %v2578_v21 = vld [vmem:[#allocation5 + $0x148] sm:$0xff]  ;;  %v3484_v13 = vpack.c.bf16 %v2671_v40, %v2670_v39  ;;  %v3488_v41 = vpack.c.bf16 %v2673_v14, %v2672_v25  ;;  %v2675_v61 = vld [vmem:[#allocation5 + $0x190] sm:$0xff] }
 0xebf   :  { %v2052_v46 = vmul.f32 %v3684_v32, %v2044_v26  ;;  %3465 = vmatprep.subr.bf16.mxu0 %v3464_v45  ;;  %v3476_v28 = vpack.c.bf16 %v2579_v23, %v2578_v21  ;;  %v2581_v32 = vld [vmem:[#allocation5 + $0x160] sm:$0xff]  ;;  %v2674_v43 = vld [vmem:[#allocation5 + $0x188] sm:$0xff]  ;;  %v2676_v26 = vld [vmem:[#allocation5 + $0x198] sm:$0xff] }
 0xec0   :  { %3243 = vmatmul.mubr.msk.f32.vlgmr.msra.gmra.mrb[26].mxu0 %vm638_vm6, %v2059_v60  ;;  %v2061_v34 = vmul.f32 %v4102_v57, %v2053_v1  ;;  %3469 = vmatprep.subr.bf16.mxu1 %v3468_v17  ;;  %v3480_v35 = vpack.c.bf16 %v2581_v32, %v2580_v24  ;;  %v3492_v44 = vpack.c.bf16 %v2675_v61, %v2674_v43  ;;  %v2679_v1 = vld [vmem:[#allocation5 + $0x1b0] sm:$0xff] }
 0xec1   :  { %v2060_v4 = vmul.f32 %v4106_v30, %v2052_v46  ;;  %3467 = vmatpush3.bf16.msra.mxu0 %v3464_v45  ;;  %3256 = vmatprep.mubr.msk.f32.mxu0 %vm638_vm6, %v2062_v54  ;;  %v2445_v30 = vld [vmem:[#allocation5 + $0x140] sm:$0xff]  ;;  %v3500_v54 = vpack.c.bf16 %v2679_v1, %v2678_v29  ;;  %v2680_v46 = vld [vmem:[#allocation5 + $0x1b8] sm:$0xff]  ;;  %v2683_v38 = vld [vmem:[#allocation5 + $0x1d0] sm:$0xff] }
 0xec2   :  { %v3472_v19 = vpack.c.bf16 %v2445_v30, %v2444_v33  ;;  %3477 = vmatprep.subr.bf16.mxu0 %v3476_v28  ;;  %v2677_v45 = vld [vmem:[#allocation5 + $0x1a0] sm:$0xff]  ;;  %v2909_v23 = vld [vmem:[#allocation5 + $0x1f7] ss:$0 sm:$0xff] }
 0xec3   :  { %3249 = vmatprep.mubr.msk.f32.mxu1 %vm638_vm6, %v2060_v4  ;;  %v3496_v60 = vpack.c.bf16 %v2677_v45, %v2676_v26  ;;  %v2681_v4 = vld [vmem:[#allocation5 + $0x1c0] sm:$0xff] }
 0xec4   :  { %3250 = vmatmul.mubr.msk.f32.vlgmr.msra.gmra.mrb[12].mxu1 %vm638_vm6, %v2061_v34  ;;  %3257 = vmatmul.mubr.msk.f32.vlgmr.msra.gmra.mrb[28].mxu0 %vm638_vm6, %v2063_v47  ;;  %v3504_v47 = vpack.c.bf16 %v2681_v4, %v2680_v46  ;;  %v2682_v34 = vld [vmem:[#allocation5 + $0x1c8] sm:$0xff] }
 0xec5   :  { %3471 = vmatpush3.bf16.msra.mxu1 %v3468_v17  ;;  %3479 = vmatpush3.bf16.msra.mxu0 %v3476_v28  ;;  %v3508_v42 = vpack.c.bf16 %v2683_v38, %v2682_v34 }
 0xec6   :  { %3473 = vmatprep.subr.bf16.mxu1 %v3472_v19  ;;  %3481 = vmatprep.subr.bf16.mxu0 %v3480_v35 }
 0xec9   :  { %3475 = vmatpush3.bf16.msra.mxu1 %v3472_v19  ;;  %3483 = vmatpush3.bf16.msra.mxu0 %v3480_v35 }
 0xeca   :  { %3485 = vmatprep.subr.bf16.mxu1 %v3484_v13 }
 0xf8f   :  { %v3237_v48 = vpop.f32.mrb[24].mxu0 }
 0xf90   :  { %v2142_v22 = vpop.f32.mrb[25].mxu0 }
 0xf93   :  { %v3244_v12 = vpop.f32.mrb[26].mxu0 }
 0xf94   :  { %2416 = vrot.lane.b32.xlu1 %v3244_v12, %s3767_s20  ;;  %v2229_v57 = vpop.f32.mrb[27].mxu0 }
 0xf95   :  { %2414 = vrot.lane.b32.xlu0 %v2229_v57, %s3767_s20 }
 0xf97   :  { %v3251_v49 = vpop.f32.mrb[12].mxu1  ;;  %v3258_v31 = vpop.f32.mrb[28].mxu0 }
 0xf98   :  { %v2316_v50 = vpop.f32.mrb[13].mxu1  ;;  %2424 = vrot.lane.b32.xlu1 %v3251_v49, %s3775_s10  ;;  %v2403_v51 = vpop.f32.mrb[29].mxu0 }
 0xf99   :  { %2422 = vrot.lane.b32.xlu0 %v2316_v50, %s3775_s10 }
 0xf9c   :  { %2432 = vrot.lane.b32.xlu1 %v3258_v31, %s3776_s11 }
 0xf9d   :  { %2430 = vrot.lane.b32.xlu0 %v2403_v51, %s3776_s11 }
0x1006   :  { %v2417_v52 = vpop.permute.xlu1 %2416 }
0x1007   :  { %v2415_v53 = vpop.permute.xlu0 %2414  ;;  %v2437_v62 = vsel %vm293_vm2, %v3237_v48, %v2417_v52 }
0x1008   :  { %v2436_v58 = vsel %vm293_vm2, %v2142_v22, %v2415_v53 }
0x100a   :  { %v2425_v55 = vpop.permute.xlu1 %2424 }
0x100b   :  { %v2423_v56 = vpop.permute.xlu0 %2422  ;;  %v2439_v2 = vsel %vm638_vm6, %v2437_v62, %v2425_v55  ;;  %v2905_v62 = vld [vmem:[#allocation5 + $0x1f5] ss:$0 sm:$0xff] }
0x100c   :  { %v2438_v63 = vsel %vm638_vm6, %v2436_v58, %v2423_v56  ;;  %v2904_v58 = vld [vmem:[#allocation5 + $0x1f4] ss:$0 sm:$0xff] }
0x100e   :  { %v2433_v59 = vpop.permute.xlu1 %2432 }
0x100f   :  { %v2431_v0 = vpop.permute.xlu0 %2430  ;;  %v2441_v5 = vsel %vm1127_vm7, %v2439_v2, %v2433_v59 }
0x1010   :  { %v2440_v3 = vsel %vm1127_vm7, %v2438_v63, %v2431_v0 }
0x1011   :  { %3267 = vmatprep.mubr.msk.f32.mxu1 %vm142_vm1, %v2440_v3 }
0x1012   :  { %3268 = vmatmul.mubr.msk.f32.vlgmr.msra.gmra.mrb[14].mxu1 %vm142_vm1, %v2441_v5 }
0x1013   :  { %3487 = vmatpush3.bf16.msra.mxu1 %v3484_v13 }
0x1014   :  { %3489 = vmatprep.subr.bf16.mxu1 %v3488_v41 }
0x1017   :  { %3491 = vmatpush3.bf16.msra.mxu1 %v3488_v41 }
0x1018   :  { %3493 = vmatprep.subr.bf16.mxu1 %v3492_v44 }
0x101b   :  { %3495 = vmatpush3.bf16.msra.mxu1 %v3492_v44 }
0x101c   :  { %3497 = vmatprep.subr.bf16.mxu1 %v3496_v60 }
0x101f   :  { %3499 = vmatpush3.bf16.msra.mxu1 %v3496_v60 }
0x1020   :  { %3501 = vmatprep.subr.bf16.mxu1 %v3500_v54 }
0x1023   :  { %3503 = vmatpush3.bf16.msra.mxu1 %v3500_v54 }
0x1024   :  { %3505 = vmatprep.subr.bf16.mxu1 %v3504_v47 }
0x1027   :  { %3507 = vmatpush3.bf16.msra.mxu1 %v3504_v47 }
0x1028   :  { %3509 = vmatprep.subr.bf16.mxu1 %v3508_v42 }
0x102b   :  { %3511 = vmatpush3.bf16.msra.mxu1 %v3508_v42 }
0x10e5   :  { %v3269_v27 = vpop.f32.mrb[14].mxu1 }
0x10e6   :  { %v2529_v7 = vadd.f32 %v3269_v27, %v2901_v6  ;;  %v2523_v8 = vpop.f32.mrb[15].mxu1 }
0x10e7   :  { %v2524_v11 = vadd.f32 %v2901_v6, %v2523_v8  ;;  %v2685_v8 = vld [vmem:[#allocation5 + $0x1e0] sm:$0xff] }
0x10e8   :  { %v4150_v15 = vadd.f32 %v2529_v7, %v4002_v36  ;;  %v2684_v7 = vld [vmem:[#allocation5 + $0x1d8] sm:$0xff] }
0x10e9   :  { %v4153_v16 = vadd.f32 %v2524_v11, %v4005_v37  ;;  %v3512_v11 = vpack.c.bf16 %v2685_v8, %v2684_v7 }
0x10ea   :  { %v2539_v18 = vsel %vm142_vm1, %v4150_v15, 0.0  ;;  %v2543_v36 = vmul.f32 %v4150_v15, %v4150_v15 }
0x10eb   :  { %2540 = vadd.xlane.f32.xlu1 %v2539_v18  ;;  %v2536_v9 = vsel %vm142_vm1, %v4153_v16, 0.0  ;;  %v2542_v10 = vmul.f32 %v4153_v16, %v4153_v16  ;;  %3513 = vmatprep.subr.bf16.mxu1 %v3512_v11  ;;  %v2906_v18 = vld [vmem:[#allocation5 + $0x1f6] ss:$0 sm:$0xff] }
0x10ec   :  { %2537 = vadd.xlane.f32.xlu0 %v2536_v9  ;;  %v2547_v37 = vsel %vm142_vm1, %v2543_v36, 0.0  ;;  %3515 = vmatpush3.bf16.msra.mxu1 %v3512_v11 }
0x10ed   :  { %v2544_v20 = vsel %vm142_vm1, %v2542_v10, 0.0 }
0x10f0   :  { %2545 = vadd.xlane.f32.xlu0 %v2544_v20 }
0x10f4   :  { %2548 = vadd.xlane.f32.xlu0 %v2547_v37 }
0x1178   :  { %v2541_v30 = vpop.xlane.xlu1 %2540 }
0x1179   :  { %v2538_v17 = vpop.xlane.xlu0 %2537  ;;  %v2551_v48 = vmul.f32 0.03125, %v2541_v30  ;;  %v2910_v30 = vld [vmem:[#allocation5 + $0x1f8] ss:$0 sm:$0xff] }
0x117a   :  { %v2550_v33 = vmul.f32 0.03125, %v2538_v17 }
0x117b   :  { %v2555_v31 = vmul.f32 %v2551_v48, %v2551_v48  ;;  %v2559_v63 = vsub.f32 %v4150_v15, %v2551_v48 }
0x117c   :  { %v2554_v22 = vmul.f32 %v2550_v33, %v2550_v33  ;;  %v2558_v55 = vsub.f32 %v4153_v16, %v2550_v33 }
0x117d   :  { %v2546_v19 = vpop.xlane.xlu0 %2545 }
0x117e   :  { %v2552_v12 = vmul.f32 0.03125, %v2546_v19 }
0x1180   :  { %v2556_v57 = vsub.f32 %v2552_v12, %v2554_v22  ;;  %v2911_v22 = vld [vmem:[#allocation5 + $0x1f9] ss:$0 sm:$0xff] }
0x1181   :  { %v2549_v49 = vpop.xlane.xlu0 %2548 }
0x1182   :  { %v2560_v50 = vadd.f32 1e-05, %v2556_v57  ;;  %v2553_v51 = vmul.f32 0.03125, %v2549_v49 }
0x1184   :  { %3685 = vrsqrt.f32 %v2560_v50  ;;  %v2557_v52 = vsub.f32 %v2553_v51, %v2555_v31 }
0x1186   :  { %v2561_v53 = vadd.f32 1e-05, %v2557_v52 }
0x1188   :  { %3687 = vrsqrt.f32 %v2561_v53 }
0x118e   :  { %v3686_v56 = vpop.eup %3685 }
0x118f   :  { %v2564_v59 = vmul.f32 %v3686_v56, %v2558_v55 }
0x1191   :  { %v2570_v0 = vmul.f32 %v2904_v58, %v2564_v59 }
0x1192   :  { %v3688_v2 = vpop.eup %3687 }
0x1193   :  { %v2565_v3 = vmul.f32 %v3688_v2, %v2559_v63  ;;  %v2576_v5 = vadd.f32 %v2905_v62, %v2570_v0 }
0x1195   :  { %v2571_v6 = vmul.f32 %v2904_v58, %v2565_v3  ;;  %3278 = vmatprep.mubr.msk.f32.mxu0 %vm142_vm1, %v2576_v5 }
0x1197   :  { %v2577_v27 = vadd.f32 %v2905_v62, %v2571_v6 }
0x1199   :  { %3279 = vmatmul.mubr.msk.f32.vlgmr.msra.gmra.mrb[30].mxu0 %vm142_vm1, %v2577_v27 }
0x126c   :  { %v3280_v9 = vpop.f32.mrb[30].mxu0 }
0x126d   :  { %v2665_v10 = vadd.f32 %v3280_v9, %v2906_v18  ;;  %v2659_v20 = vpop.f32.mrb[31].mxu0 }
0x126e   :  { %v2660_v36 = vadd.f32 %v2906_v18, %v2659_v20 }
0x126f   :  { %v2669_v21 = vmax.f32 %v2665_v10, 0.0 }
0x1270   :  { %v2668_v37 = vmax.f32 %v2660_v36, 0.0 }
0x1272   :  { %3313 = vmatprep.mubr.f32.mxu1 %v2668_v37 }
0x1273   :  { %3314 = vmatmul.mubr.f32.vlgmr.msra.gmra.mrb[16].mxu1 %v2669_v21 }
0x1346   :  { %v3315_v24 = vpop.f32.mrb[16].mxu1 }
0x1347   :  { %v2763_v28 = vadd.f32 %v3315_v24, %v2909_v23  ;;  %v2757_v32 = vpop.f32.mrb[17].mxu1 }
0x1348   :  { %v2758_v35 = vadd.f32 %v2909_v23, %v2757_v32 }
0x1349   :  { %v2767_v39 = vadd.f32 %v2763_v28, %v4150_v15 }
0x134a   :  { %v2766_v40 = vadd.f32 %v2758_v35, %v4153_v16 }
0x134b   :  { %v2773_v25 = vsel %vm142_vm1, %v2767_v39, 0.0  ;;  %v2777_v13 = vmul.f32 %v2767_v39, %v2767_v39 }
0x134c   :  { %2774 = vadd.xlane.f32.xlu1 %v2773_v25  ;;  %v2770_v14 = vsel %vm142_vm1, %v2766_v40, 0.0  ;;  %v2776_v41 = vmul.f32 %v2766_v40, %v2766_v40 }
0x134d   :  { %2771 = vadd.xlane.f32.xlu0 %v2770_v14  ;;  %v2781_v43 = vsel %vm142_vm1, %v2777_v13, 0.0 }
0x134e   :  { %v2778_v61 = vsel %vm142_vm1, %v2776_v41, 0.0 }
0x1350   :  { %2782 = vadd.xlane.f32.xlu1 %v2781_v43 }
0x1351   :  { %2779 = vadd.xlane.f32.xlu0 %v2778_v61 }
0x13d9   :  { %v2775_v44 = vpop.xlane.xlu1 %2774 }
0x13da   :  { %v2785_v26 = vmul.f32 0.03125, %v2775_v44  ;;  %v2772_v45 = vpop.xlane.xlu0 %2771 }
0x13db   :  { %v2784_v15 = vmul.f32 0.03125, %v2772_v45 }
0x13dc   :  { %v2789_v16 = vmul.f32 %v2785_v26, %v2785_v26  ;;  %v2793_v42 = vsub.f32 %v2767_v39, %v2785_v26 }
0x13dd   :  { %v2783_v60 = vpop.xlane.xlu1 %2782  ;;  %v2788_v54 = vmul.f32 %v2784_v15, %v2784_v15  ;;  %v2792_v33 = vsub.f32 %v2766_v40, %v2784_v15 }
0x13de   :  { %v2787_v29 = vmul.f32 0.03125, %v2783_v60  ;;  %v2780_v1 = vpop.xlane.xlu0 %2779 }
0x13df   :  { %v2786_v46 = vmul.f32 0.03125, %v2780_v1 }
0x13e0   :  { %v2791_v4 = vsub.f32 %v2787_v29, %v2789_v16 }
0x13e1   :  { %v2790_v47 = vsub.f32 %v2786_v46, %v2788_v54 }
0x13e2   :  { %v2795_v34 = vadd.f32 1e-05, %v2791_v4 }
0x13e3   :  { %v2794_v38 = vadd.f32 1e-05, %v2790_v47 }
0x13e4   :  { %3689 = vrsqrt.f32 %v2795_v34 }
0x13e5   :  { %3691 = vrsqrt.f32 %v2794_v38 }
0x13ee   :  { %v3690_v17 = vpop.eup %3689 }
0x13ef   :  { %v3692_v19 = vpop.eup %3691  ;;  %v2799_v48 = vmul.f32 %v3690_v17, %v2793_v42 }
0x13f0   :  { %v2798_v12 = vmul.f32 %v3692_v19, %v2792_v33 }
0x13f1   :  { %v2805_v57 = vmul.f32 %v2910_v30, %v2799_v48 }
0x13f2   :  { %v2804_v49 = vmul.f32 %v2910_v30, %v2798_v12 }
0x13f3   :  { %v2811_v31 = vadd.f32 %v2911_v22, %v2805_v57 }
0x13f4   :  { %v2810_v50 = vadd.f32 %v2911_v22, %v2804_v49 }
0x13f5   :  { %2813 = vst.msk [vmem:[#allocation7 + $0x8] sm:$0xff] %vm142_vm1, %v2811_v31 }
0x13f6   :  { %2812 = vst.msk [vmem:[#allocation7] sm:$0xff] %vm142_vm1, %v2810_v50 }
0x13f7   :  { %3748 = shalt.err (!%p3745_p6)
}
0x13f8   :  { %s3749_s17 = scalar_lea.hbm %s4194_s2, 256 }
0x13f9   :  { %p3750_p7 = scmp.ne.s32.totalorder %s4194_s2, %s3749_s17  ;;  %p3753_p8 = scmp.lt.u32.totalorder %s3749_s17, %s4194_s2 }
0x13fb   :  { %p3755_p9 = pnand %p3753_p8, %p3750_p7 }
0x13fd   :  { %3758 = shalt.err (!%p3755_p9)
}
0x13fe   :  { %2825 = dma.vmem_to_hbm [thread:$0]  %s2820_s13, 256, %s4194_s2, [#allocation4], %s3766_s19, %s3766_s19, %s3767_s20  }
0x13ff   :  { %3763 = dma.done.wait [#allocation4], 256  }
0x1400   :  { %3764 = vsyncadd [#allocation4], 4294967040 }
0x1401   :  { %2829 = vsyncpa [#allocation3], 1 }
0x1402   :  { %2830 = vsyncpa [#allocation6], 1 }
0x1403   :  { %2831 = vsyncpa [#allocation4], 1 }

</bundles_post_ra>
